<compile_context>
chip_gen: v5e
topology: v5e:2x2
jax: 0.10.0
libtpu: 0.0.40
codegen_flags: <defaults>
</compile_context>

<pallas_src>
import jax
import jax.numpy as jnp
from jax.experimental import pallas as pl
from jax.experimental.pallas import tpu as pltpu

NEG_SLOPE = 0.2
NEG_INF = -1e30


def gatv2_kernel(x_ref, wcat_ref, bcat_ref, att_ref, p_ref, pt_ref, bias_ref,
                 s_ref, d_ref, logw_ref, out_ref,
                 xl_sc, xr_sc, m_sc, l_sc, acc_sc):
    t = pl.program_id(0)
    HC = xl_sc.shape[1]

    @pl.when(t == 0)
    def _init():
        # Fused projection x @ [W_l | W_r]  (single matmul, doubles MXU lane occupancy).
        x_cat = jnp.dot(x_ref[...], wcat_ref[...],
                        preferred_element_type=jnp.float32) + bcat_ref[...]   # [N, 2*HC]
        xl_sc[...] = x_cat[:, :HC]
        xr_sc[...] = x_cat[:, HC:]
        m_sc[...] = jnp.full_like(m_sc, NEG_INF)
        l_sc[...] = jnp.zeros_like(l_sc)
        acc_sc[...] = jnp.zeros_like(acc_sc)

    S = s_ref[...]                                   # [tE, N] bf16 one-hot (source)
    D = d_ref[...]                                   # [tE, N] bf16 one-hot (dest)

    # Gather source / dest features via bf16 MXU matmuls (f32 accumulate).
    x_j = jnp.dot(S, xl_sc[...].astype(jnp.bfloat16),
                  preferred_element_type=jnp.float32)            # [tE, HC]
    x_i = jnp.dot(D, xr_sc[...].astype(jnp.bfloat16),
                  preferred_element_type=jnp.float32)            # [tE, HC]

    # Elementwise math stays f32 (v5e VPU has no bf16).
    z = x_i + x_j
    z = jnp.where(z > 0, z, NEG_SLOPE * z)                       # leaky_relu
    scores = jnp.dot(z * att_ref[...], p_ref[...],
                     preferred_element_type=jnp.float32)         # [tE, H]
    alpha = scores + logw_ref[...]                               # [tE, H] (+ log(edge_weight))

    # Per-destination running max for ALL heads in one masked op (no per-head loop).
    masked = jnp.where(D[:, None, :] != 0, alpha[:, :, None], NEG_INF)   # [tE, H, N]
    m_new = jnp.maximum(m_sc[...], jnp.max(masked, axis=0))              # [H, N]

    # Gather each edge's destination max back via the MXU ([tE,N] x [N->H]).
    max_e = jnp.einsum("en,hn->eh", D.astype(jnp.float32), m_new,
                       preferred_element_type=jnp.float32)               # [tE, H]
    p_exp = jnp.exp(alpha - max_e)                                       # [tE, H]

    # Online-softmax rescale of previous accumulators.
    corr = jnp.exp(m_sc[...] - m_new)                                    # [H, N]
    corr_b = jnp.einsum("hn,hc->nc", corr, pt_ref[...],
                        preferred_element_type=jnp.float32)              # [N, HC]

    # Segment-sum of exp(alpha) over destinations: contraction over the edge axis
    # (expresses D^T without materializing / DMA'ing a transpose).
    l_sc[...] = l_sc[...] * corr + jnp.einsum(
        "en,eh->hn", D, p_exp.astype(jnp.bfloat16),
        preferred_element_type=jnp.float32)                              # [H, N]

    # Weighted messages, scatter-added into the [N, HC] accumulator (bf16 MXU).
    p_b = jnp.dot(p_exp, pt_ref[...],
                  preferred_element_type=jnp.float32)                    # [tE, HC]
    msg = (x_j * p_b).astype(jnp.bfloat16)                               # [tE, HC]
    acc_sc[...] = acc_sc[...] * corr_b + jnp.einsum(
        "en,ec->nc", D, msg, preferred_element_type=jnp.float32)         # [N, HC]
    m_sc[...] = m_new

    @pl.when(t == pl.num_programs(0) - 1)
    def _finalize():
        # Divide once at the end; reciprocal on the EUP slot (otherwise idle).
        inv_l = pl.reciprocal(l_sc[...] + 1e-16, approx=True)            # [H, N]
        inv_b = jnp.einsum("hn,hc->nc", inv_l, pt_ref[...],
                           preferred_element_type=jnp.float32)           # [N, HC]
        out_ref[...] = acc_sc[...] * inv_b + bias_ref[...]


def add_self_loops_mean(edge_index, edge_weight, num_nodes):
    """PyG add_self_loops(..., fill_value='mean'): self-loop weight = mean of incoming weights."""
    src, dst = edge_index
    deg = jax.ops.segment_sum(jnp.ones_like(edge_weight), dst, num_segments=num_nodes)
    wsum = jax.ops.segment_sum(edge_weight, dst, num_segments=num_nodes)
    loop_w = wsum / jnp.maximum(deg, 1.0)
    loop = jnp.arange(num_nodes, dtype=src.dtype)
    return (jnp.concatenate([src, loop]),
            jnp.concatenate([dst, loop]),
            jnp.concatenate([edge_weight, loop_w]))


def weighted_gatv2_layer(x, edge_index, edge_weight, params, *, heads, per_head,
                         edge_tile=32):
    N, F = x.shape
    H, C = heads, per_head
    HC = H * C

    src, dst, w = add_self_loops_mean(edge_index, edge_weight, N)
    E = src.shape[0]
    num_tiles = max(1, pl.cdiv(E, edge_tile))
    E_pad = num_tiles * edge_tile
    pad = E_pad - E

    # Pad with dummy edges: out-of-range index -> all-zero one-hot rows, alpha -> -inf,
    # so padded edges contribute exactly nothing to max / denom / accumulator.
    src_p = jnp.concatenate([src, jnp.full((pad,), -1, src.dtype)])
    dst_p = jnp.concatenate([dst, jnp.full((pad,), -1, dst.dtype)])
    logw = jnp.concatenate([jnp.log(w), jnp.full((pad,), NEG_INF, jnp.float32)])

    # One-hots are exact in bf16 -> half the DMA/VMEM, 3x MXU throughput on the gathers.
    S = jax.nn.one_hot(src_p, N, dtype=jnp.bfloat16)          # [E_pad, N]
    D = jax.nn.one_hot(dst_p, N, dtype=jnp.bfloat16)          # [E_pad, N]
    logw_h = jnp.broadcast_to(logw[:, None], (E_pad, H)).astype(jnp.float32)

    # Fused projection weights and per-head sum / broadcast matrices.
    W_cat = jnp.concatenate([params["W_l"], params["W_r"]], axis=1)      # [F, 2*HC]
    b_cat = jnp.concatenate([params["b_l"], params["b_r"]]).reshape(1, 2 * HC)
    att = params["att"].reshape(1, HC)
    P = jnp.zeros((HC, H), jnp.float32).at[jnp.arange(HC), jnp.arange(HC) // C].set(1.0)
    PT = P.T
    bias = params["bias"].reshape(1, HC)

    def full(shape):
        return pl.BlockSpec(shape, lambda i, _s=shape: (0,) * len(_s))

    grid_spec = pltpu.PrefetchScalarGridSpec(
        num_scalar_prefetch=0,
        grid=(num_tiles,),
        in_specs=[
            full((N, F)),                                       # x
            full((F, 2 * HC)),                                  # W_cat
            full((1, 2 * HC)),                                  # b_cat
            full((1, HC)),                                      # att
            full((HC, H)),                                      # P
            full((H, HC)),                                      # PT
            full((1, HC)),                                      # bias
            pl.BlockSpec((edge_tile, N), lambda i: (i, 0)),     # S tile
            pl.BlockSpec((edge_tile, N), lambda i: (i, 0)),     # D tile
            pl.BlockSpec((edge_tile, H), lambda i: (i, 0)),     # log(edge_weight) tile
        ],
        out_specs=pl.BlockSpec((N, HC), lambda i: (0, 0)),      # resident accumulator output
        scratch_shapes=[
            pltpu.VMEM((N, HC), jnp.float32),   # x_l
            pltpu.VMEM((N, HC), jnp.float32),   # x_r
            pltpu.VMEM((H, N), jnp.float32),    # running per-destination max
            pltpu.VMEM((H, N), jnp.float32),    # running softmax denominator
            pltpu.VMEM((N, HC), jnp.float32),   # output accumulator
        ],
    )

    out = pl.pallas_call(
        gatv2_kernel,
        out_shape=jax.ShapeDtypeStruct((N, HC), jnp.float32),
        grid_spec=grid_spec,
        compiler_params=pltpu.CompilerParams(
            dimension_semantics=("arbitrary",),   # sequential reduction over edge tiles
            vmem_limit_bytes=32 * 1024 * 1024,    # fits v5e/v6e/v7x scoped + physical VMEM
        ),
    )(x, W_cat, b_cat, att, P, PT, bias, S, D, logw_h)
    return out


def ref_forward(x, edge_index, edge_weight, params, *, heads, per_head):
    """Pure-JAX f32 reference mirroring PyG WeightedGATv2ConvLayer forward."""
    N, _ = x.shape
    H, C = heads, per_head
    src, dst, w = add_self_loops_mean(edge_index, edge_weight, N)
    x_l = (x @ params["W_l"] + params["b_l"]).reshape(N, H, C)
    x_r = (x @ params["W_r"] + params["b_r"]).reshape(N, H, C)
    x_j = x_l[src]
    x_i = x_r[dst]
    z = jax.nn.leaky_relu(x_i + x_j, NEG_SLOPE)
    alpha = (z * params["att"].reshape(1, H, C)).sum(-1) + jnp.log(w)[:, None]
    seg_max = jax.ops.segment_max(alpha, dst, num_segments=N)
    alpha_exp = jnp.exp(alpha - seg_max[dst])
    denom = jax.ops.segment_sum(alpha_exp, dst, num_segments=N)
    alpha_sm = alpha_exp / (denom[dst] + 1e-16)
    msg = (x_j * alpha_sm[:, :, None]).reshape(src.shape[0], H * C)
    out = jax.ops.segment_sum(msg, dst, num_segments=N)
    return out + params["bias"]


def init_params(key, dim_in, heads, per_head):
    HC = heads * per_head
    ks = jax.random.split(key, 6)

    def glorot(k, shape, fan_in, fan_out):
        lim = (6.0 / (fan_in + fan_out)) ** 0.5
        return jax.random.uniform(k, shape, jnp.float32, -lim, lim)

    return {
        "W_l": glorot(ks[0], (dim_in, HC), dim_in, HC),
        "W_r": glorot(ks[1], (dim_in, HC), dim_in, HC),
        "att": glorot(ks[2], (heads, per_head), per_head, per_head),
        # PyG inits these to zero; use small deterministic values to exercise the bias path.
        "b_l": 0.01 * jax.random.normal(ks[3], (HC,), jnp.float32),
        "b_r": 0.01 * jax.random.normal(ks[4], (HC,), jnp.float32),
        "bias": 0.01 * jax.random.normal(ks[5], (HC,), jnp.float32),
    }


if __name__ == "__main__":
    N, F = 16, 16           # nodes, input features (layer_config.dim_in)
    heads, per_head = 4, 8  # cfg.gnn.att_heads, dim_out // heads  -> dim_out = 32

    key = jax.random.PRNGKey(0)
    kx, kw, kp = jax.random.split(key, 3)

    x = jax.random.normal(kx, (N, F), jnp.float32)

    # deterministic graph with no self-loops; every node has incoming edges
    ar = jnp.arange(N, dtype=jnp.int32)
    src = jnp.concatenate([ar, ar])
    dst = jnp.concatenate([(ar + 1) % N, (ar + 3) % N])
    edge_index = jnp.stack([src, dst])                       # [2, 32]
    edge_weight = jax.random.uniform(kw, (src.shape[0],), jnp.float32, 0.5, 1.5)

    params = init_params(kp, F, heads, per_head)

    out = weighted_gatv2_layer(x, edge_index, edge_weight, params,
                               heads=heads, per_head=per_head, edge_tile=32)
    out = jax.block_until_ready(out)

    ref = ref_forward(x, edge_index, edge_weight, params, heads=heads, per_head=per_head)
    assert out.shape == (N, heads * per_head)
    # Tolerance accounts for intentional bf16 MXU inputs (one-hots, gathered features,
    # messages) and the approx reciprocal; algorithm is otherwise exact per-segment softmax.
    assert jnp.allclose(out, ref, atol=5e-2, rtol=5e-2), \
        f"max abs err = {jnp.max(jnp.abs(out - ref))}"

    print("KERNEL_OK")
</pallas_src>

<mosaic_0001>
module attributes {stable_mosaic.version = 11 : i64} {
  func.func @gatv2_kernel(%arg0: i32, %arg1: memref<16x16xf32, #tpu.memory_space<vmem>>, %arg2: memref<16x64xf32, #tpu.memory_space<vmem>>, %arg3: memref<1x64xf32, #tpu.memory_space<vmem>>, %arg4: memref<1x32xf32, #tpu.memory_space<vmem>>, %arg5: memref<32x4xf32, #tpu.memory_space<vmem>>, %arg6: memref<4x32xf32, #tpu.memory_space<vmem>>, %arg7: memref<1x32xf32, #tpu.memory_space<vmem>>, %arg8: memref<32x16xbf16, #tpu.memory_space<vmem>>, %arg9: memref<32x16xbf16, #tpu.memory_space<vmem>>, %arg10: memref<32x4xf32, #tpu.memory_space<vmem>>, %arg11: memref<16x32xf32, #tpu.memory_space<vmem>>, %arg12: memref<16x32xf32, #tpu.memory_space<vmem>>, %arg13: memref<16x32xf32, #tpu.memory_space<vmem>>, %arg14: memref<4x16xf32, #tpu.memory_space<vmem>>, %arg15: memref<4x16xf32, #tpu.memory_space<vmem>>, %arg16: memref<16x32xf32, #tpu.memory_space<vmem>>) attributes {dimension_semantics = [#tpu.dimension_semantics<arbitrary>], iteration_bounds = array<i64: 2>, scalar_prefetch = 0 : i64, scratch_operands = 5 : i64, tpu.core_type = #tpu.core_type<tc>, window_params = [{pipeline_mode = #tpu.pipeline_mode<synchronous>, transform_indices = @transform_0, window_bounds = array<i64: 16, 16>}, {pipeline_mode = #tpu.pipeline_mode<synchronous>, transform_indices = @transform_1, window_bounds = array<i64: 16, 64>}, {pipeline_mode = #tpu.pipeline_mode<synchronous>, transform_indices = @transform_2, window_bounds = array<i64: 1, 64>}, {pipeline_mode = #tpu.pipeline_mode<synchronous>, transform_indices = @transform_3, window_bounds = array<i64: 1, 32>}, {pipeline_mode = #tpu.pipeline_mode<synchronous>, transform_indices = @transform_4, window_bounds = array<i64: 32, 4>}, {pipeline_mode = #tpu.pipeline_mode<synchronous>, transform_indices = @transform_5, window_bounds = array<i64: 4, 32>}, {pipeline_mode = #tpu.pipeline_mode<synchronous>, transform_indices = @transform_6, window_bounds = array<i64: 1, 32>}, {transform_indices = @transform_7, window_bounds = array<i64: 32, 16>}, {transform_indices = @transform_8, window_bounds = array<i64: 32, 16>}, {transform_indices = @transform_9, window_bounds = array<i64: 32, 4>}, {pipeline_mode = #tpu.pipeline_mode<synchronous>, transform_indices = @transform_10, window_bounds = array<i64: 16, 32>}]} {
    %c0_i32 = arith.constant 0 : i32
    %0 = arith.cmpi eq, %arg0, %c0_i32 : i32
    %1 = arith.extui %0 : i1 to i32
    %c0_i32_0 = arith.constant 0 : i32
    %2 = arith.cmpi ne, %1, %c0_i32_0 : i32
    scf.if %2 {
      %c0_45 = arith.constant 0 : index
      %c0_46 = arith.constant 0 : index
      %65 = vector.load %arg1[%c0_45, %c0_46] : memref<16x16xf32, #tpu.memory_space<vmem>>, vector<16x16xf32>
      %c0_47 = arith.constant 0 : index
      %c0_48 = arith.constant 0 : index
      %66 = vector.load %arg2[%c0_47, %c0_48] : memref<16x64xf32, #tpu.memory_space<vmem>>, vector<16x64xf32>
      %cst_49 = arith.constant dense<0.000000e+00> : vector<16x64xf32>
      %67 = tpu.matmul %65, %66, %cst_49 {dimension_numbers = #tpu.dot_dimension_numbers<[1], [0], [0], [1], [0, 0, 1, 1], [], []>} : vector<16x16xf32>, vector<16x64xf32>, vector<16x64xf32> -> vector<16x64xf32>
      %c0_50 = arith.constant 0 : index
      %c0_51 = arith.constant 0 : index
      %68 = vector.load %arg3[%c0_50, %c0_51] : memref<1x64xf32, #tpu.memory_space<vmem>>, vector<1x64xf32>
      %69 = vector.broadcast %68 : vector<1x64xf32> to vector<16x64xf32>
      %70 = arith.addf %67, %69 : vector<16x64xf32>
      %71 = vector.extract_strided_slice %70 {offsets = [0, 0], sizes = [16, 32], strides = [1, 1]} : vector<16x64xf32> to vector<16x32xf32>
      %c0_52 = arith.constant 0 : index
      %c0_53 = arith.constant 0 : index
      %72 = vector.load %arg12[%c0_52, %c0_53] : memref<16x32xf32, #tpu.memory_space<vmem>>, vector<16x32xf32>
      tpu.vector_store %arg12[%c0_52, %c0_53], %71 {strides = array<i32>} : memref<16x32xf32, #tpu.memory_space<vmem>>, vector<16x32xf32>,
      %73 = vector.extract_strided_slice %70 {offsets = [0, 32], sizes = [16, 32], strides = [1, 1]} : vector<16x64xf32> to vector<16x32xf32>
      %c0_54 = arith.constant 0 : index
      %c0_55 = arith.constant 0 : index
      %74 = vector.load %arg13[%c0_54, %c0_55] : memref<16x32xf32, #tpu.memory_space<vmem>>, vector<16x32xf32>
      tpu.vector_store %arg13[%c0_54, %c0_55], %73 {strides = array<i32>} : memref<16x32xf32, #tpu.memory_space<vmem>>, vector<16x32xf32>,
      %cst_56 = arith.constant -1.000000e+30 : f32
      %75 = vector.broadcast %cst_56 : f32 to vector<4x16xf32>
      %c0_57 = arith.constant 0 : index
      %c0_58 = arith.constant 0 : index
      %76 = vector.load %arg14[%c0_57, %c0_58] : memref<4x16xf32, #tpu.memory_space<vmem>>, vector<4x16xf32>
      tpu.vector_store %arg14[%c0_57, %c0_58], %75 {strides = array<i32>} : memref<4x16xf32, #tpu.memory_space<vmem>>, vector<4x16xf32>,
      %cst_59 = arith.constant 0.000000e+00 : f32
      %77 = vector.broadcast %cst_59 : f32 to vector<4x16xf32>
      %c0_60 = arith.constant 0 : index
      %c0_61 = arith.constant 0 : index
      %78 = vector.load %arg15[%c0_60, %c0_61] : memref<4x16xf32, #tpu.memory_space<vmem>>, vector<4x16xf32>
      tpu.vector_store %arg15[%c0_60, %c0_61], %77 {strides = array<i32>} : memref<4x16xf32, #tpu.memory_space<vmem>>, vector<4x16xf32>,
      %cst_62 = arith.constant 0.000000e+00 : f32
      %79 = vector.broadcast %cst_62 : f32 to vector<16x32xf32>
      %c0_63 = arith.constant 0 : index
      %c0_64 = arith.constant 0 : index
      %80 = vector.load %arg16[%c0_63, %c0_64] : memref<16x32xf32, #tpu.memory_space<vmem>>, vector<16x32xf32>
      tpu.vector_store %arg16[%c0_63, %c0_64], %79 {strides = array<i32>} : memref<16x32xf32, #tpu.memory_space<vmem>>, vector<16x32xf32>,
    } else {
    }
    %c0 = arith.constant 0 : index
    %c0_1 = arith.constant 0 : index
    %3 = vector.load %arg8[%c0, %c0_1] : memref<32x16xbf16, #tpu.memory_space<vmem>>, vector<32x16xbf16>
    %c0_2 = arith.constant 0 : index
    %c0_3 = arith.constant 0 : index
    %4 = vector.load %arg9[%c0_2, %c0_3] : memref<32x16xbf16, #tpu.memory_space<vmem>>, vector<32x16xbf16>
    %c0_4 = arith.constant 0 : index
    %c0_5 = arith.constant 0 : index
    %5 = vector.load %arg12[%c0_4, %c0_5] : memref<16x32xf32, #tpu.memory_space<vmem>>, vector<16x32xf32>
    %6 = arith.truncf %5 : vector<16x32xf32> to vector<16x32xbf16>
    %cst = arith.constant dense<0.000000e+00> : vector<32x32xf32>
    %7 = tpu.matmul %3, %6, %cst {dimension_numbers = #tpu.dot_dimension_numbers<[1], [0], [0], [1], [0, 0, 1, 1], [], []>} : vector<32x16xbf16>, vector<16x32xbf16>, vector<32x32xf32> -> vector<32x32xf32>
    %c0_6 = arith.constant 0 : index
    %c0_7 = arith.constant 0 : index
    %8 = vector.load %arg13[%c0_6, %c0_7] : memref<16x32xf32, #tpu.memory_space<vmem>>, vector<16x32xf32>
    %9 = arith.truncf %8 : vector<16x32xf32> to vector<16x32xbf16>
    %cst_8 = arith.constant dense<0.000000e+00> : vector<32x32xf32>
    %10 = tpu.matmul %4, %9, %cst_8 {dimension_numbers = #tpu.dot_dimension_numbers<[1], [0], [0], [1], [0, 0, 1, 1], [], []>} : vector<32x16xbf16>, vector<16x32xbf16>, vector<32x32xf32> -> vector<32x32xf32>
    %11 = arith.addf %10, %7 : vector<32x32xf32>
    %cst_9 = arith.constant 0.000000e+00 : f32
    %12 = vector.broadcast %cst_9 : f32 to vector<32x32xf32>
    %13 = arith.cmpf ogt, %11, %12 : vector<32x32xf32>
    %cst_10 = arith.constant 2.000000e-01 : f32
    %14 = vector.broadcast %cst_10 : f32 to vector<32x32xf32>
    %15 = arith.mulf %14, %11 : vector<32x32xf32>
    %16 = arith.select %13, %11, %15 : vector<32x32xi1>, vector<32x32xf32>
    %c0_11 = arith.constant 0 : index
    %c0_12 = arith.constant 0 : index
    %17 = vector.load %arg4[%c0_11, %c0_12] : memref<1x32xf32, #tpu.memory_space<vmem>>, vector<1x32xf32>
    %18 = vector.broadcast %17 : vector<1x32xf32> to vector<32x32xf32>
    %19 = arith.mulf %16, %18 : vector<32x32xf32>
    %c0_13 = arith.constant 0 : index
    %c0_14 = arith.constant 0 : index
    %20 = vector.load %arg5[%c0_13, %c0_14] : memref<32x4xf32, #tpu.memory_space<vmem>>, vector<32x4xf32>
    %cst_15 = arith.constant dense<0.000000e+00> : vector<32x4xf32>
    %21 = tpu.matmul %19, %20, %cst_15 {dimension_numbers = #tpu.dot_dimension_numbers<[1], [0], [0], [1], [0, 0, 1, 1], [], []>} : vector<32x32xf32>, vector<32x4xf32>, vector<32x4xf32> -> vector<32x4xf32>
    %c0_16 = arith.constant 0 : index
    %c0_17 = arith.constant 0 : index
    %22 = vector.load %arg10[%c0_16, %c0_17] : memref<32x4xf32, #tpu.memory_space<vmem>>, vector<32x4xf32>
    %23 = arith.addf %21, %22 : vector<32x4xf32>
    %24 = vector.shape_cast %4 : vector<32x16xbf16> to vector<32x1x16xbf16>
    %cst_18 = arith.constant 0.000000e+00 : bf16
    %25 = vector.broadcast %cst_18 : bf16 to vector<32x1x16xbf16>
    %26 = arith.cmpf one, %24, %25 : vector<32x1x16xbf16>
    %27 = vector.shape_cast %23 : vector<32x4xf32> to vector<32x4x1xf32>
    %cst_19 = arith.constant -1.000000e+30 : f32
    %28 = vector.shape_cast %26 : vector<32x1x16xi1> to vector<32x1x16xi1>
    %29 = vector.broadcast %28 : vector<32x1x16xi1> to vector<32x4x16xi1>
    %30 = vector.shape_cast %27 : vector<32x4x1xf32> to vector<32x4x1xf32>
    %31 = vector.broadcast %30 : vector<32x4x1xf32> to vector<32x4x16xf32>
    %32 = vector.broadcast %cst_19 : f32 to vector<32x4x16xf32>
    %33 = arith.select %29, %31, %32 : vector<32x4x16xi1>, vector<32x4x16xf32>
    %c0_20 = arith.constant 0 : index
    %c0_21 = arith.constant 0 : index
    %34 = vector.load %arg14[%c0_20, %c0_21] : memref<4x16xf32, #tpu.memory_space<vmem>>, vector<4x16xf32>
    %cst_22 = arith.constant dense<0xFF800000> : vector<4x16xf32>
    %35 = vector.multi_reduction <maximumf>, %33, %cst_22 [0] : vector<32x4x16xf32> to vector<4x16xf32>
    %36 = arith.maximumf %34, %35 : vector<4x16xf32>
    %37 = arith.extf %4 : vector<32x16xbf16> to vector<32x16xf32>
    "tpu.trace_start"() <{level = 10 : i32, message = "en,hn->eh"}> : () -> ()
    %cst_23 = arith.constant dense<0.000000e+00> : vector<32x4xf32>
    %38 = tpu.matmul %37, %36, %cst_23 {dimension_numbers = #tpu.dot_dimension_numbers<[1], [1], [0], [0], [0, 0, 1, 0], [], []>} : vector<32x16xf32>, vector<4x16xf32>, vector<32x4xf32> -> vector<32x4xf32>
    "tpu.trace_stop"() : () -> ()
    %39 = arith.subf %23, %38 : vector<32x4xf32>
    %40 = math.exp %39 : vector<32x4xf32>
    %c0_24 = arith.constant 0 : index
    %c0_25 = arith.constant 0 : index
    %41 = vector.load %arg14[%c0_24, %c0_25] : memref<4x16xf32, #tpu.memory_space<vmem>>, vector<4x16xf32>
    %42 = arith.subf %41, %36 : vector<4x16xf32>
    %43 = math.exp %42 : vector<4x16xf32>
    %c0_26 = arith.constant 0 : index
    %c0_27 = arith.constant 0 : index
    %44 = vector.load %arg6[%c0_26, %c0_27] : memref<4x32xf32, #tpu.memory_space<vmem>>, vector<4x32xf32>
    "tpu.trace_start"() <{level = 10 : i32, message = "hn,hc->nc"}> : () -> ()
    %cst_28 = arith.constant dense<0.000000e+00> : vector<16x32xf32>
    %45 = tpu.matmul %43, %44, %cst_28 {dimension_numbers = #tpu.dot_dimension_numbers<[0], [0], [1], [1], [0, 1, 1, 1], [], []>} : vector<4x16xf32>, vector<4x32xf32>, vector<16x32xf32> -> vector<16x32xf32>
    "tpu.trace_stop"() : () -> ()
    %c0_29 = arith.constant 0 : index
    %c0_30 = arith.constant 0 : index
    %46 = vector.load %arg15[%c0_29, %c0_30] : memref<4x16xf32, #tpu.memory_space<vmem>>, vector<4x16xf32>
    %47 = arith.mulf %46, %43 : vector<4x16xf32>
    %48 = arith.truncf %40 : vector<32x4xf32> to vector<32x4xbf16>
    "tpu.trace_start"() <{level = 10 : i32, message = "en,eh->hn"}> : () -> ()
    %cst_31 = arith.constant dense<0.000000e+00> : vector<4x16xf32>
    %49 = tpu.matmul %48, %4, %cst_31 {dimension_numbers = #tpu.dot_dimension_numbers<[0], [0], [1], [1], [0, 1, 1, 1], [], []>} : vector<32x4xbf16>, vector<32x16xbf16>, vector<4x16xf32> -> vector<4x16xf32>
    "tpu.trace_stop"() : () -> ()
    %50 = arith.addf %47, %49 : vector<4x16xf32>
    %c0_32 = arith.constant 0 : index
    %c0_33 = arith.constant 0 : index
    %51 = vector.load %arg15[%c0_32, %c0_33] : memref<4x16xf32, #tpu.memory_space<vmem>>, vector<4x16xf32>
    tpu.vector_store %arg15[%c0_32, %c0_33], %50 {strides = array<i32>} : memref<4x16xf32, #tpu.memory_space<vmem>>, vector<4x16xf32>,
    %c0_34 = arith.constant 0 : index
    %c0_35 = arith.constant 0 : index
    %52 = vector.load %arg6[%c0_34, %c0_35] : memref<4x32xf32, #tpu.memory_space<vmem>>, vector<4x32xf32>
    %cst_36 = arith.constant dense<0.000000e+00> : vector<32x32xf32>
    %53 = tpu.matmul %40, %52, %cst_36 {dimension_numbers = #tpu.dot_dimension_numbers<[1], [0], [0], [1], [0, 0, 1, 1], [], []>} : vector<32x4xf32>, vector<4x32xf32>, vector<32x32xf32> -> vector<32x32xf32>
    %54 = arith.mulf %7, %53 : vector<32x32xf32>
    %55 = arith.truncf %54 : vector<32x32xf32> to vector<32x32xbf16>
    %c0_37 = arith.constant 0 : index
    %c0_38 = arith.constant 0 : index
    %56 = vector.load %arg16[%c0_37, %c0_38] : memref<16x32xf32, #tpu.memory_space<vmem>>, vector<16x32xf32>
    %57 = arith.mulf %56, %45 : vector<16x32xf32>
    "tpu.trace_start"() <{level = 10 : i32, message = "en,ec->nc"}> : () -> ()
    %cst_39 = arith.constant dense<0.000000e+00> : vector<16x32xf32>
    %58 = tpu.matmul %4, %55, %cst_39 {dimension_numbers = #tpu.dot_dimension_numbers<[0], [0], [1], [1], [0, 1, 1, 1], [], []>} : vector<32x16xbf16>, vector<32x32xbf16>, vector<16x32xf32> -> vector<16x32xf32>
    "tpu.trace_stop"() : () -> ()
    %59 = arith.addf %57, %58 : vector<16x32xf32>
    %c0_40 = arith.constant 0 : index
    %c0_41 = arith.constant 0 : index
    %60 = vector.load %arg16[%c0_40, %c0_41] : memref<16x32xf32, #tpu.memory_space<vmem>>, vector<16x32xf32>
    tpu.vector_store %arg16[%c0_40, %c0_41], %59 {strides = array<i32>} : memref<16x32xf32, #tpu.memory_space<vmem>>, vector<16x32xf32>,
    %c0_42 = arith.constant 0 : index
    %c0_43 = arith.constant 0 : index
    %61 = vector.load %arg14[%c0_42, %c0_43] : memref<4x16xf32, #tpu.memory_space<vmem>>, vector<4x16xf32>
    tpu.vector_store %arg14[%c0_42, %c0_43], %36 {strides = array<i32>} : memref<4x16xf32, #tpu.memory_space<vmem>>, vector<4x16xf32>,
    %c1_i32 = arith.constant 1 : i32
    %62 = arith.cmpi eq, %arg0, %c1_i32 : i32
    %63 = arith.extui %62 : i1 to i32
    %c0_i32_44 = arith.constant 0 : i32
    %64 = arith.cmpi ne, %63, %c0_i32_44 : i32
    scf.if %64 {
      %c0_45 = arith.constant 0 : index
      %c0_46 = arith.constant 0 : index
      %65 = vector.load %arg15[%c0_45, %c0_46] : memref<4x16xf32, #tpu.memory_space<vmem>>, vector<4x16xf32>
      %cst_47 = arith.constant 1.000000e-16 : f32
      %66 = vector.broadcast %cst_47 : f32 to vector<4x16xf32>
      %67 = arith.addf %65, %66 : vector<4x16xf32>
      %68 = tpu.reciprocal %67 {approx = true} : vector<4x16xf32> -> vector<4x16xf32>
      %c0_48 = arith.constant 0 : index
      %c0_49 = arith.constant 0 : index
      %69 = vector.load %arg6[%c0_48, %c0_49] : memref<4x32xf32, #tpu.memory_space<vmem>>, vector<4x32xf32>
      "tpu.trace_start"() <{level = 10 : i32, message = "hn,hc->nc"}> : () -> ()
      %cst_50 = arith.constant dense<0.000000e+00> : vector<16x32xf32>
      %70 = tpu.matmul %68, %69, %cst_50 {dimension_numbers = #tpu.dot_dimension_numbers<[0], [0], [1], [1], [0, 1, 1, 1], [], []>} : vector<4x16xf32>, vector<4x32xf32>, vector<16x32xf32> -> vector<16x32xf32>
      "tpu.trace_stop"() : () -> ()
      %c0_51 = arith.constant 0 : index
      %c0_52 = arith.constant 0 : index
      %71 = vector.load %arg16[%c0_51, %c0_52] : memref<16x32xf32, #tpu.memory_space<vmem>>, vector<16x32xf32>
      %72 = arith.mulf %71, %70 : vector<16x32xf32>
      %c0_53 = arith.constant 0 : index
      %c0_54 = arith.constant 0 : index
      %73 = vector.load %arg7[%c0_53, %c0_54] : memref<1x32xf32, #tpu.memory_space<vmem>>, vector<1x32xf32>
      %74 = vector.broadcast %73 : vector<1x32xf32> to vector<16x32xf32>
      %75 = arith.addf %72, %74 : vector<16x32xf32>
      %c0_55 = arith.constant 0 : index
      %c0_56 = arith.constant 0 : index
      %76 = vector.load %arg11[%c0_55, %c0_56] : memref<16x32xf32, #tpu.memory_space<vmem>>, vector<16x32xf32>
      tpu.vector_store %arg11[%c0_55, %c0_56], %75 {strides = array<i32>} : memref<16x32xf32, #tpu.memory_space<vmem>>, vector<16x32xf32>,
    } else {
    }
    return
  }
  func.func @transform_0(%arg0: i32) -> (i32, i32) {
    %c0_i32 = arith.constant 0 : i32
    %c0_i32_0 = arith.constant 0 : i32
    %c0_i32_1 = arith.constant 0 : i32
    return %c0_i32, %c0_i32_0 : i32, i32
  }
  func.func @transform_1(%arg0: i32) -> (i32, i32) {
    %c0_i32 = arith.constant 0 : i32
    %c0_i32_0 = arith.constant 0 : i32
    %c0_i32_1 = arith.constant 0 : i32
    return %c0_i32, %c0_i32_0 : i32, i32
  }
  func.func @transform_2(%arg0: i32) -> (i32, i32) {
    %c0_i32 = arith.constant 0 : i32
    %c0_i32_0 = arith.constant 0 : i32
    %c0_i32_1 = arith.constant 0 : i32
    return %c0_i32, %c0_i32_0 : i32, i32
  }
  func.func @transform_3(%arg0: i32) -> (i32, i32) {
    %c0_i32 = arith.constant 0 : i32
    %c0_i32_0 = arith.constant 0 : i32
    %c0_i32_1 = arith.constant 0 : i32
    return %c0_i32, %c0_i32_0 : i32, i32
  }
  func.func @transform_4(%arg0: i32) -> (i32, i32) {
    %c0_i32 = arith.constant 0 : i32
    %c0_i32_0 = arith.constant 0 : i32
    %c0_i32_1 = arith.constant 0 : i32
    return %c0_i32, %c0_i32_0 : i32, i32
  }
  func.func @transform_5(%arg0: i32) -> (i32, i32) {
    %c0_i32 = arith.constant 0 : i32
    %c0_i32_0 = arith.constant 0 : i32
    %c0_i32_1 = arith.constant 0 : i32
    return %c0_i32, %c0_i32_0 : i32, i32
  }
  func.func @transform_6(%arg0: i32) -> (i32, i32) {
    %c0_i32 = arith.constant 0 : i32
    %c0_i32_0 = arith.constant 0 : i32
    %c0_i32_1 = arith.constant 0 : i32
    return %c0_i32, %c0_i32_0 : i32, i32
  }
  func.func @transform_7(%arg0: i32) -> (i32, i32) {
    %c0_i32 = arith.constant 0 : i32
    %c0_i32_0 = arith.constant 0 : i32
    return %arg0, %c0_i32 : i32, i32
  }
  func.func @transform_8(%arg0: i32) -> (i32, i32) {
    %c0_i32 = arith.constant 0 : i32
    %c0_i32_0 = arith.constant 0 : i32
    return %arg0, %c0_i32 : i32, i32
  }
  func.func @transform_9(%arg0: i32) -> (i32, i32) {
    %c0_i32 = arith.constant 0 : i32
    %c0_i32_0 = arith.constant 0 : i32
    return %arg0, %c0_i32 : i32, i32
  }
  func.func @transform_10(%arg0: i32) -> (i32, i32) {
    %c0_i32 = arith.constant 0 : i32
    %c0_i32_0 = arith.constant 0 : i32
    %c0_i32_1 = arith.constant 0 : i32
    return %c0_i32, %c0_i32_0 : i32, i32
  }
}

</mosaic_0001>

<bundles_post_ra>
// kernel: tpu_custom_call.1
= control target key start
LH: loop header
LB: loop body
LE: loop exit
PB: predicated region body
PF: predicated region fallthrough
CT: control target
= control target key end

     0   :  { %15 = vsyncpa [#allocation8], 0  ;;  %s2031_s13 = smov 0   ;;  %s2800_s0 = inlined_call_operand.vmem [shape: f32[16,16], index: 0, kind: input, shape index: {}]   ;;  %s2801_s1 = inlined_call_operand.vmem [shape: f32[16,64], index: 1, kind: input, shape index: {}]   ;;  %s2802_s2 = inlined_call_operand.vmem [shape: f32[1,64], index: 2, kind: input, shape index: {}]   ;;  %s2803_s3 = inlined_call_operand.vmem [shape: f32[1,32], index: 3, kind: input, shape index: {}]   ;;  %s2804_s4 = inlined_call_operand.vmem [shape: f32[32,4], index: 4, kind: input, shape index: {}]   ;;  %s2805_s5 = inlined_call_operand.vmem [shape: f32[4,32], index: 5, kind: input, shape index: {}]   ;;  %s2806_s6 = inlined_call_operand.vmem [shape: f32[1,32], index: 6, kind: input, shape index: {}]   ;;  %s2807_s7 = inlined_call_operand.vmem [shape: bf16[64,16], index: 7, kind: input, shape index: {}]   ;;  %s2808_s8 = inlined_call_operand.vmem [shape: bf16[64,16], index: 8, kind: input, shape index: {}]   ;;  %s2809_s9 = inlined_call_operand.vmem [shape: f32[64,4], index: 9, kind: input, shape index: {}]   ;;  %s2810_s10 = inlined_call_operand.hbm [shape: f32[16,32], index: 10, kind: output, shape index: {}]  }
   0x1 LB: > { %s2037_s14 = sadd.s32 4294967295, %s1966_s13   ;;  %p1799_p0 = scmp.ge.s32.totalorder %s1966_s13, 1  ;;  %s1966_s13 = sphi %s2031_s13, %s21_s13  }
   0x2   : > { %p331_p1 = scmp.lt.s32.totalorder %s1966_s13, 3 }
   0x4   : > { %p332_p2 = pnand %p1799_p0, %p331_p1 }
   0x5   : > { %s1800_s15 = sshll.u32 (!%p332_p2), %s2037_s14, 2  ;;  %p1806_p4 = scmp.ne.s32.totalorder (!%p332_p2), %s2037_s14, 0 }
   0x6   : > { %335 = sbr.rel (%p332_p2) target bundleno = 1533 (0x5fd), region = 60  ;;  %p375_p3 = scmp.lt.s32.totalorder (!%p332_p2), %s1800_s15, 7 }
   0xb   : > { %s2885_s15 = smov (!%p375_p3, %s1800_s15), 7  ;;  %396 = sbr.rel (%p1806_p4) target bundleno = 272 (0x110), region = 64 }
   0xc   : > { %s1801_s16 = sshll.u32 %s2885_s15, 2  ;;  %s1805_s17 = sshll.u32 %s2885_s15, 3 }
   0xd   : > { %s2045_s20 = scalar_lea.vmem %s2807_s7, %s1801_s16  ;;  %s2050_s23 = scalar_lea.vmem %s2808_s8, %s1801_s16 }
   0xe   : > { %s2055_s26 = scalar_lea.vmem %s2809_s9, %s1805_s17  ;;  %s1970_s19 = smov (!%p1806_p4), 96  }
  0x10   : > { %v400_v0 = vld [vmem:[%s2801_s1 + $0x8] sm:$0xff]  ;;  %v399_v1 = vld [vmem:[%s2801_s1] sm:$0xff]  ;;  %vm405_vm0 = vcmask 130048   ;;  %vm448_vm1 = vcmask 125952   ;;  %v1968_v4 = vmov -1e+30  }
  0x11   : > { %426 = vmatpush.msra.mxu0 %v400_v0  ;;  %v397_v2 = vld [vmem:[%s2800_s0] sm:$0xff]  ;;  %1876 = vmatpush.msra.mxu1 %v400_v0  ;;  %v398_v3 = vld [vmem:[%s2800_s0 + $0x8] sm:$0xff]  ;;  %449 = vst.msk [vmem:[#allocation4] sm:$0xf] %vm448_vm1, %v1968_v4  ;;  %vm435_vm2 = vcmask 261120   ;;  %v1969_v5 = vmov 0.0  }
  0x12   : > { %450 = vst.msk [vmem:[#allocation5] sm:$0xf] %vm448_vm1, %v1969_v5  ;;  %v1904_v6 = vld [vmem:[%s2802_s2] ss:$0 sm:$0xff] }
  0x13   : > { %427 = vmatpush.msra.mxu0 %v399_v1  ;;  %1877 = vmatpush.msra.mxu1 %v399_v1  ;;  %451 = vst.msk [vmem:[#allocation6] sm:$0xff] %vm435_vm2, %v1969_v5 }
  0x14   : > { %1807 = vmatmul.msk.f32.vlgmr.msra.gmra.mxu0 %vm405_vm0, %v397_v2  ;;  %1808 = vmatmul.msk.f32.vlgmr.msra.gmra.mxu1 %vm405_vm0, %v398_v3  ;;  %452 = vst.msk [vmem:[#allocation6 + $0x8] sm:$0xff] %vm435_vm2, %v1969_v5 }
  0x91   : > { %v429_v7 = vpop.f32.mrf.mxu0  ;;  %v432_v8 = vpop.f32.mrf.mxu1 }
  0x92   : > { %v430_v9 = vadd.f32 %v1904_v6, %v429_v7  ;;  %v433_v10 = vadd.f32 %v1904_v6, %v432_v8 }
  0x94   : > { %436 = vst.msk [vmem:[#allocation2] sm:$0xff] %vm435_vm2, %v430_v9  ;;  %440 = vrot.lane.b32.xlu0 %v430_v9, %s1970_s19 }
  0x95   : > { %437 = vst.msk [vmem:[#allocation2 + $0x8] sm:$0xff] %vm435_vm2, %v433_v10 }
  0x9c   : > { %442 = vrot.lane.b32.xlu0 %v433_v10, %s1970_s19 }
 0x106   : > { %v441_v11 = vpop.permute.xlu0 %440 }
 0x107   : > { %446 = vst.msk [vmem:[#allocation3] sm:$0xff] %vm435_vm2, %v441_v11 }
 0x10e   : > { %v443_v12 = vpop.permute.xlu0 %442 }
 0x10f   : > { %447 = vst.msk [vmem:[#allocation3 + $0x8] sm:$0xff] %vm435_vm2, %v443_v12 }
 0x110 PF: > { %v461_v13 = vld [vmem:[#allocation2] sm:$0xff]  ;;  %v462_v14 = vld [vmem:[#allocation2 + $0x8] sm:$0xff]  ;;  %v500_v15 = vld [vmem:[#allocation3] sm:$0xff]  ;;  %vm474_vm3 = vcmask 130048   ;;  %v957_v29 = vlaneseq  ;;  %vm566_vm5 = vcmask 261120   ;;  %vm621_vm9 = vcmask 1042434  }
 0x111   : > { %v463_v16 = vpack.c.bf16 %v462_v14, %v461_v13  ;;  %v1872_v19 = vld [vmem:[%s2045_s20] sm:$0xff]  ;;  %v1875_v21 = vld [vmem:[%s2050_s23 + $0x8] sm:$0xff]  ;;  %v561_v23 = vld [vmem:[%s2804_s4 + $0x18] sm:$0xff]  ;;  %vm617_vm10 = vcmask 1041409   ;;  %vm612_vm11 = vcmask 1040384   ;;  %vm625_vm12 = vcmask 1043459  }
 0x112   : > { %v1874_v20 = vld [vmem:[%s2050_s23] sm:$0xff]  ;;  %v1873_v22 = vld [vmem:[%s2045_s20 + $0x8] sm:$0xff]  ;;  %591 = vmatpush.msra.mxu2 %v561_v23  ;;  %v560_v24 = vld [vmem:[%s2804_s4 + $0x10] sm:$0xff]  ;;  %v958_v32 = vshrl.u32 %v957_v29, 7  ;;  %p1864_p5 = scmp.ne.s32.totalorder %s2037_s14, 1 }
 0x113   : > { %488 = vmatpush.bf16.msra.mxu0 %v463_v16  ;;  %v559_v25 = vld [vmem:[%s2804_s4 + $0x8] sm:$0xff]  ;;  %v558_v26 = vld [vmem:[%s2804_s4] sm:$0xff]  ;;  %v564_v10 = vld [vmem:[%s2055_s26 + $0x10] sm:$0xff] }
 0x114   : > { %592 = vmatpush.msra.mxu2 %v560_v24  ;;  %v1912_v31 = vld [vmem:[%s2803_s3] ss:$0 sm:$0xff]  ;;  %1907 = vset.pattern.permute.xlu2 %v958_v32  ;;  %v563_v62 = vld [vmem:[%s2055_s26 + $0x8] sm:$0xff] }
 0x115   : > { %1906 = vset.pattern.permute.xlu1 %v958_v32  ;;  %1905 = vset.pattern.permute.xlu0 %v958_v32  ;;  %v562_v54 = vld [vmem:[%s2055_s26] sm:$0xff] }
 0x116   : > { %v501_v17 = vld [vmem:[#allocation3 + $0x8] sm:$0xff]  ;;  %1817 = vmatmul.msk.bf16.vlgmr.msra.gmra.mxu0 %vm474_vm3, %v1872_v19  ;;  %593 = vmatpush.msra.mxu2 %v559_v25 }
 0x117   : > { %v502_v18 = vpack.c.bf16 %v501_v17, %v500_v15 }
 0x118   : > { %594 = vmatpush.msra.mxu2 %v558_v26 }
 0x119   : > { %526 = vmatpush.bf16.msra.mxu1 %v502_v18 }
 0x11c   : > { %1827 = vmatmul.msk.bf16.vlgmr.msra.gmra.mxu1 %vm474_vm3, %v1874_v20 }
 0x11d   : > { %1536 = vmatpush.bf16.msrb.mxu1 %v1875_v21 }
 0x121   : > { %1537 = vmatpush.bf16.msrb.mxu1 %v1874_v20 }
 0x126   : > { %1818 = vmatmul.msk.bf16.gmra.mxu0 %vm474_vm3, %v1873_v22  ;;  %v565_v22 = vld [vmem:[%s2055_s26 + $0x18] sm:$0xff] }
 0x12c   : > { %1828 = vmatmul.msk.bf16.gmra.mxu1 %vm474_vm3, %v1875_v21 }
 0x193   : > { %v2099_v27 = vpop.f32.mrf.mxu0 }
 0x199   : > { %v528_v28 = vpop.f32.mrf.mxu1 }
 0x19a   : > { %v529_v30 = vadd.f32 %v528_v28, %v2099_v27 }
 0x19b   : > { %v2105_v36 = vpop.f32.mrf.mxu0 }
 0x19c   : > { %vm538_vm4 = vcmp.gt.f32.partialorder %v529_v30, 0.0  ;;  %v542_v33 = vmul.f32 0.2, %v529_v30 }
 0x19e   : > { %v546_v34 = vsel %vm538_vm4, %v529_v30, %v542_v33  ;;  %vm1309_vm4 = vcmask 125952  }
 0x19f   : > { %v554_v35 = vmul.f32 %v1912_v31, %v546_v34 }
 0x1a1   : > { %v530_v37 = vpop.f32.mrf.mxu1  ;;  %1829 = vmatmul.msk.f32.vlgmr.msra.gmra.mxu2 %vm566_vm5, %v554_v35  ;;  %v2163_v35 = vld [vmem:[%s2050_s23] sm:$0xf] }
 0x1a2   : > { %v531_v38 = vadd.f32 %v530_v37, %v2105_v36  ;;  %v608_v37 = vrot.slane %v2163_v35, 3 }
 0x1a3   : > { %v2109_v42 = vpop.f32.mrf.mxu0 }
 0x1a4   : > { %vm539_vm6 = vcmp.gt.f32.partialorder %v531_v38, 0.0  ;;  %v543_v39 = vmul.f32 0.2, %v531_v38 }
 0x1a6   : > { %v547_v40 = vsel %vm539_vm6, %v531_v38, %v543_v39  ;;  %v622_v38 = vsel %vm621_vm9, %v2163_v35, %v608_v37 }
 0x1a7   : > { %v555_v41 = vmul.f32 %v1912_v31, %v547_v40  ;;  %v624_v39 = vrot.slane %v622_v38, 2  ;;  %v1971_v40 = vmov 286326784  }
 0x1a9   : > { %1830 = vmatmul.msk.f32.gmra.mxu2 %vm566_vm5, %v555_v41  ;;  %v533_v43 = vpop.f32.mrf.mxu1  ;;  %v733_v41 = vunpack.c.l.s4 %v1971_v40 }
 0x1aa   : > { %v534_v44 = vadd.f32 %v533_v43, %v2109_v42  ;;  %v2169_v43 = vld [vmem:[%s2050_s23 + $0x4] sm:$0xf] }
 0x1ab   : > { %v2113_v48 = vpop.f32.mrf.mxu0 }
 0x1ac   : > { %vm540_vm7 = vcmp.gt.f32.partialorder %v534_v44, 0.0  ;;  %v544_v45 = vmul.f32 0.2, %v534_v44 }
 0x1ae   : > { %v548_v46 = vsel %vm540_vm7, %v534_v44, %v544_v45  ;;  %v2174_v45 = vrot.slane %v2169_v43, 3 }
 0x1af   : > { %v556_v47 = vmul.f32 %v1912_v31, %v548_v46  ;;  %v1835_v46 = vpack.i.b16 %v624_v39, %v624_v39 }
 0x1b1   : > { %v535_v49 = vpop.f32.mrf.mxu1  ;;  %1831 = vmatmul.msk.f32.gmra.mxu2 %vm566_vm5, %v556_v47  ;;  %v2176_v47 = vunpack.c.0.s8 %v733_v41 }
 0x1b2   : > { %v536_v50 = vadd.f32 %v535_v49, %v2113_v48  ;;  %v673_v49 = vunpack.i.h.s16 %v624_v39 }
 0x1b4   : > { %vm541_vm8 = vcmp.gt.f32.partialorder %v536_v50, 0.0  ;;  %v545_v51 = vmul.f32 0.2, %v536_v50 }
 0x1b6   : > { %v549_v52 = vsel %vm541_vm8, %v536_v50, %v545_v51  ;;  %v633_v50 = vsel %vm617_vm10, %v2169_v43, %v2174_v45  ;;  %v618_v51 = vsel %vm617_vm10, %v2163_v35, %v608_v37 }
 0x1b7   : > { %v557_v53 = vmul.f32 %v1912_v31, %v549_v52  ;;  %v751_v52 = vperm.slane %v1835_v46, %v2176_v47 }
 0x1b9   : > { %1832 = vmatmul.msk.f32.gmra.mxu2 %vm566_vm5, %v557_v53  ;;  %v2184_v53 = vrot.slane %v633_v50, 1 }
 0x224   : > { %v596_v55 = vpop.f32.mrf.mxu2 }
 0x225   : > { %v2119_v56 = vadd.f32 %v596_v55, %v562_v54  ;;  %v705_v54 = vpack.i.b16 %v673_v49, %v673_v49  ;;  %v2189_v55 = vsel %vm612_vm11, %v2169_v43, %v2174_v45 }
 0x227   : > { %v984_v57 = vperm.slane %v2119_v56, 4  ;;  %v970_v58 = vperm.slane %v2119_v56, 2  ;;  %v956_v59 = vperm.slane %v2119_v56, 0  ;;  %v991_v60 = vperm.slane %v2119_v56, 5 }
 0x228   : > { %v977_v61 = vperm.slane %v2119_v56, 3  ;;  %v963_v0 = vperm.slane %v2119_v56, 1  ;;  %v1005_v2 = vperm.slane %v2119_v56, 7  ;;  %v998_v4 = vperm.slane %v2119_v56, 6 }
 0x229   : > { %989 = vperm.xlu2 %1907, %v984_v57   ;;  %975 = vperm.xlu1 %1906, %v970_v58   ;;  %v620_v57 = vrot.slane %v618_v51, 1  ;;  %v615_v58 = vsel %vm612_vm11, %v2163_v35, %v608_v37 }
 0x22a   : > { %961 = vperm.xlu0 %1905, %v956_v59  }
 0x22c   : > { %v599_v63 = vpop.f32.mrf.mxu2 }
 0x22d   : > { %v2128_v1 = vadd.f32 %v599_v63, %v563_v62  ;;  %v1837_v62 = vpack.i.b16 %v2189_v55, %v2189_v55  ;;  %v679_v63 = vunpack.i.h.s16 %v2184_v53 }
 0x22f   : > { %v1012_v3 = vperm.slane %v2128_v1, 0  ;;  %v1026_v5 = vperm.slane %v2128_v1, 2  ;;  %v1033_v6 = vperm.slane %v2128_v1, 3  ;;  %v1019_v7 = vperm.slane %v2128_v1, 1 }
 0x230   : > { %v1047_v8 = vperm.slane %v2128_v1, 5  ;;  %v1054_v9 = vperm.slane %v2128_v1, 6  ;;  %v1040_v11 = vperm.slane %v2128_v1, 4  ;;  %v1061_v16 = vperm.slane %v2128_v1, 7 }
 0x231   : > { %996 = vperm.xlu2 %1907, %v991_v60   ;;  %982 = vperm.xlu1 %1906, %v977_v61   ;;  %v626_v60 = vsel %vm625_vm12, %v2163_v35, %v608_v37  ;;  %v896_v61 = vunpack.c.l.bf16 %v751_v52 }
 0x232   : > { %968 = vperm.xlu0 %1905, %v963_v0   ;;  %v755_v0 = vperm.slane %v705_v54, %v2176_v47 }
 0x233   : > { %vm928_vm13 = vcmp.ne.f32.partialorder %v896_v61, 0.0  ;;  %v636_v61 = vsel %vm621_vm9, %v2169_v43, %v2174_v45 }
 0x234   : > { %v602_v12 = vpop.f32.mrf.mxu2 }
 0x235   : > { %v2140_v13 = vadd.f32 %v602_v12, %v564_v10  ;;  %v639_v10 = vsel %vm625_vm12, %v2169_v43, %v2174_v45  ;;  %v711_v12 = vpack.i.b16 %v679_v63, %v679_v63 }
 0x237   : > { %v1075_v14 = vperm.slane %v2140_v13, 1  ;;  %v1068_v15 = vperm.slane %v2140_v13, 0  ;;  %v1096_v17 = vperm.slane %v2140_v13, 4  ;;  %v1089_v18 = vperm.slane %v2140_v13, 3 }
 0x238   : > { %v1082_v19 = vperm.slane %v2140_v13, 2  ;;  %v1117_v20 = vperm.slane %v2140_v13, 7  ;;  %v1110_v21 = vperm.slane %v2140_v13, 6  ;;  %v1103_v24 = vperm.slane %v2140_v13, 5 }
 0x239   : > { %1010 = vperm.xlu1 %1906, %v1005_v2   ;;  %1017 = vperm.xlu2 %1907, %v1012_v3   ;;  %v1834_v2 = vpack.i.b16 %v620_v57, %v620_v57  ;;  %v1833_v3 = vpack.i.b16 %v615_v58, %v615_v58 }
 0x23a   : > { %1003 = vperm.xlu0 %1905, %v998_v4   ;;  %v671_v4 = vunpack.i.h.s16 %v620_v57 }
 0x23c   : > { %v605_v23 = vpop.f32.mrf.mxu2 }
 0x23d   : > { %v2152_v25 = vadd.f32 %v605_v23, %v565_v22  ;;  %v1972_v22 = vmov 0  }
 0x23e   : > { %v1184_v23 = vsel %vm928_vm13, 1, %v1972_v22 }
 0x23f   : > { %v1138_v26 = vperm.slane %v2152_v25, 2  ;;  %v1131_v28 = vperm.slane %v2152_v25, 1  ;;  %v1124_v29 = vperm.slane %v2152_v25, 0  ;;  %v1159_v30 = vperm.slane %v2152_v25, 5 }
 0x240   : > { %v1152_v31 = vperm.slane %v2152_v25, 4  ;;  %v1145_v32 = vperm.slane %v2152_v25, 3  ;;  %v1173_v33 = vperm.slane %v2152_v25, 7  ;;  %v1166_v34 = vperm.slane %v2152_v25, 6 }
 0x241   : > { %1031 = vperm.xlu1 %1906, %v1026_v5   ;;  %1038 = vperm.xlu2 %1907, %v1033_v6   ;;  %v2202_v5 = vld [vmem:[%s2050_s23 + $0x8] sm:$0xf]  ;;  %v1216_v38 = vperm.slane %v1184_v23, 0 }
 0x242   : > { %1024 = vperm.xlu0 %1905, %v1019_v7   ;;  %v628_v7 = vrot.slane %v626_v60, 3 }
 0x243   : > { %vm2254_vm2 = vcmp.eq.s32.totalorder %v1216_v38, 1 }
 0x244   : > { %v1836_v60 = vpack.i.b16 %v628_v7, %v628_v7 }
 0x249   : > { %1052 = vperm.xlu1 %1906, %v1047_v8   ;;  %1059 = vperm.xlu2 %1907, %v1054_v9   ;;  %v669_v9 = vunpack.i.h.s16 %v615_v58 }
 0x24a   : > { %1045 = vperm.xlu0 %1905, %v1040_v11   ;;  %v767_v11 = vperm.slane %v1837_v62, %v2176_v47 }
 0x251   : > { %1080 = vperm.xlu2 %1907, %v1075_v14   ;;  %1073 = vperm.xlu1 %1906, %v1068_v15   ;;  %v2213_v14 = vrot.slane %v2202_v5, 3  ;;  %v897_v15 = vunpack.c.l.bf16 %v755_v0 }
 0x252   : > { %1066 = vperm.xlu0 %1905, %v1061_v16   ;;  %v743_v16 = vperm.slane %v1834_v2, %v2176_v47 }
 0x253   : > { %vm929_vm14 = vcmp.ne.f32.partialorder %v897_v15, 0.0  ;;  %v649_v54 = vsel %vm621_vm9, %v2202_v5, %v2213_v14 }
 0x254   : > { %v1185_v46 = vsel %vm929_vm14, 1, %v1972_v22 }
 0x255   : > { %v1217_v63 = vperm.slane %v1185_v46, 0 }
 0x257   : > { %vm2283_vm13 = vcmp.eq.s32.totalorder %v1217_v63, 1 }
 0x259   : > { %1101 = vperm.xlu2 %1907, %v1096_v17   ;;  %1094 = vperm.xlu1 %1906, %v1089_v18   ;;  %v735_v17 = vperm.slane %v1833_v3, %v2176_v47  ;;  %v703_v18 = vpack.i.b16 %v671_v4, %v671_v4  ;;  %v677_v4 = vunpack.i.h.s16 %v2189_v55 }
 0x25a   : > { %1087 = vperm.xlu0 %1905, %v1082_v19   ;;  %v2217_v19 = vrot.slane %v639_v10, 3 }
 0x261   : > { %1122 = vperm.xlu2 %1907, %v1117_v20   ;;  %1115 = vperm.xlu1 %1906, %v1110_v21   ;;  %v675_v20 = vunpack.i.h.s16 %v628_v7  ;;  %v701_v21 = vpack.i.b16 %v669_v9, %v669_v9  ;;  %v2260_v9 = vrot.slane %v649_v54, 2  ;;  %v652_v7 = vsel %vm625_vm12, %v2202_v5, %v2213_v14 }
 0x262   : > { %1108 = vperm.xlu0 %1905, %v1103_v24   ;;  %v900_v24 = vunpack.c.l.bf16 %v767_v11  ;;  %v638_v11 = vrot.slane %v636_v61, 2  ;;  %v2281_v23 = vrot.slane %v652_v7, 3  ;;  %v683_v7 = vunpack.i.h.s16 %v2217_v19 }
 0x263   : > { %v707_v37 = vpack.i.b16 %v675_v20, %v675_v20  ;;  %v739_v39 = vperm.slane %v701_v21, %v2176_v47  ;;  %v1838_v21 = vpack.i.b16 %v2184_v53, %v2184_v53 }
 0x264   : > { %vm932_vm15 = vcmp.ne.f32.partialorder %v900_v24, 0.0  ;;  %v691_v54 = vunpack.i.h.s16 %v2281_v23  ;;  %v1839_v61 = vpack.i.b16 %v638_v11, %v638_v11 }
 0x265   : > { %v763_v58 = vperm.slane %v707_v37, %v2176_v47  ;;  %v893_v0 = vunpack.c.l.bf16 %v739_v39  ;;  %v1188_v3 = vsel %vm932_vm15, 1, %v1972_v22  ;;  %v681_v39 = vunpack.i.h.s16 %v638_v11 }
 0x266   : > { %v775_v51 = vperm.slane %v1838_v21, %v2176_v47 }
 0x267   : > { %vm925_vm8 = vcmp.ne.f32.partialorder %v893_v0, 0.0 }
 0x268   : > { %v902_v11 = vunpack.c.l.bf16 %v775_v51  ;;  %v646_v51 = vsel %vm617_vm10, %v2202_v5, %v2213_v14 }
 0x269   : > { %1143 = vperm.xlu2 %1907, %v1138_v26   ;;  %1136 = vperm.xlu1 %1906, %v1131_v28   ;;  %v779_v26 = vperm.slane %v711_v12, %v2176_v47  ;;  %v2224_v28 = vsel %vm612_vm11, %v2202_v5, %v2213_v14  ;;  %v899_v12 = vunpack.c.l.bf16 %v763_v58  ;;  %v648_v24 = vrot.slane %v646_v51, 1 }
 0x26a   : > { %1129 = vperm.xlu0 %1905, %v1124_v29   ;;  %v685_v41 = vunpack.i.h.s16 %v2224_v28 }
 0x26b   : > { %v903_v49 = vunpack.c.l.bf16 %v779_v26  ;;  %v1220_v26 = vperm.slane %v1188_v3, 0  ;;  %vm931_vm15 = vcmp.ne.f32.partialorder %v899_v12, 0.0  ;;  %v783_v12 = vperm.slane %v1839_v61, %v2176_v47 }
 0x26c   : > { %v717_v2 = vpack.i.b16 %v685_v41, %v685_v41  ;;  %v2298_v41 = vsel %vm925_vm8, 1, %v1972_v22  ;;  %v1842_v0 = vpack.i.b16 %v648_v24, %v648_v24 }
 0x26d   : > { %vm935_vm6 = vcmp.ne.f32.partialorder %v903_v49, 0.0  ;;  %v904_v61 = vunpack.c.l.bf16 %v783_v12 }
 0x26e   : > { %v803_v20 = vperm.slane %v717_v2, %v2176_v47  ;;  %v687_v2 = vunpack.i.h.s16 %v648_v24 }
 0x270   : > { %v909_v50 = vunpack.c.l.bf16 %v803_v20 }
 0x271   : > { %1164 = vperm.xlu2 %1907, %v1159_v30   ;;  %1157 = vperm.xlu1 %1906, %v1152_v31   ;;  %v894_v30 = vunpack.c.l.bf16 %v743_v16  ;;  %v892_v31 = vunpack.c.l.bf16 %v735_v17  ;;  %v759_v16 = vperm.slane %v1836_v60, %v2176_v47 }
 0x272   : > { %1150 = vperm.xlu0 %1905, %v1145_v32   ;;  %v747_v32 = vperm.slane %v703_v18, %v2176_v47 }
 0x273   : > { %vm2238_vm0 = vcmp.ne.f32.partialorder %v894_v30, 0.0  ;;  %vm2242_vm1 = vcmp.ne.f32.partialorder %v892_v31, 0.0  ;;  %v1191_v30 = vsel %vm935_vm6, 1, %v1972_v22  ;;  %v709_v31 = vpack.i.b16 %v677_v4, %v677_v4 }
 0x274   : > { %v895_v52 = vunpack.c.l.bf16 %v747_v32  ;;  %v1182_v45 = vsel %vm2238_vm0, 1, %v1972_v22  ;;  %v1180_v10 = vsel %vm2242_vm1, 1, %v1972_v22  ;;  %v1843_v32 = vpack.i.b16 %v2260_v9, %v2260_v9 }
 0x275   : > { %v1214_v37 = vperm.slane %v1182_v45, 0  ;;  %v1212_v38 = vperm.slane %v1180_v10, 0  ;;  %v898_v49 = vunpack.c.l.bf16 %v759_v16  ;;  %v771_v58 = vperm.slane %v709_v31, %v2176_v47 }
 0x276   : > { %vm927_vm7 = vcmp.ne.f32.partialorder %v895_v52, 0.0  ;;  %v1223_v52 = vperm.slane %v1191_v30, 0  ;;  %v815_v60 = vperm.slane %v1843_v32, %v2176_v47  ;;  %vm2314_vm0 = vcmp.eq.s32.totalorder %v1220_v26, 1 }
 0x277   : > { %v2295_v53 = vsel %vm927_vm7, 1, %v1972_v22  ;;  %vm2318_vm1 = vcmp.eq.s32.totalorder %v1212_v38, 1  ;;  %v713_v4 = vpack.i.b16 %v681_v39, %v681_v39  ;;  %v1213_v45 = vperm.slane %v2298_v41, 0 }
 0x278   : > { %v1215_v3 = vperm.slane %v2295_v53, 0  ;;  %vm941_vm6 = vcmp.ne.f32.partialorder %v909_v50, 0.0  ;;  %v723_v16 = vpack.i.b16 %v691_v54, %v691_v54  ;;  %v901_v21 = vunpack.c.l.bf16 %v771_v58 }
 0x279   : > { %1178 = vperm.xlu1 %1906, %v1173_v33   ;;  %v912_v26 = vunpack.c.l.bf16 %v815_v60  ;;  %v787_v38 = vperm.slane %v713_v4, %v2176_v47  ;;  %v715_v53 = vpack.i.b16 %v683_v7, %v683_v7  ;;  %vm2347_vm7 = vcmp.eq.s32.totalorder %v1214_v37, 1 }
 0x27a   : > { %1171 = vperm.xlu0 %1905, %v1166_v34   ;;  %v1840_v34 = vpack.i.b16 %v2217_v19, %v2217_v19  ;;  %v2353_v46 = vsel %vm941_vm6, 1, %v1972_v22  ;;  %vm2363_vm8 = vcmp.eq.s32.totalorder %v1223_v52, 1  ;;  %v827_v58 = vperm.slane %v723_v16, %v2176_v47 }
 0x27b   : > { %v1841_v50 = vpack.i.b16 %v2224_v28, %v2224_v28  ;;  %v905_v14 = vunpack.c.l.bf16 %v787_v38  ;;  %v1229_v4 = vperm.slane %v2353_v46, 0  ;;  %vm2415_vm6 = vcmp.eq.s32.totalorder %v1213_v45, 1 }
 0x27c   : > { %v791_v57 = vperm.slane %v1840_v34, %v2176_v47  ;;  %v2291_v34 = vld [vmem:[%s2050_s23 + $0xc] sm:$0xf] }
 0x27e   : > { %v906_v55 = vunpack.c.l.bf16 %v791_v57  ;;  %v2307_v57 = vrot.slane %v2291_v34, 3 }
 0x280   : > { %vm2300_vm14 = vcmp.ne.f32.partialorder %v906_v55, 0.0  ;;  %v659_v19 = vsel %vm617_vm10, %v2291_v34, %v2307_v57 }
 0x281   : > { %v1194_v62 = vsel %vm2300_vm14, 1, %v1972_v22  ;;  %vm934_vm14 = vcmp.ne.f32.partialorder %v902_v11, 0.0 }
 0x282   : > { %v1226_v30 = vperm.slane %v1194_v62, 0  ;;  %v2380_v28 = vsel %vm934_vm14, 1, %v1972_v22 }
 0x283   : > { %v2171_v44 = vpop.permute.xlu2 %989 }
 0x284   : > { %v1280_v63 = vsel %vm2254_vm2, %v2171_v44, -1e+30  ;;  %v1187_v44 = vsel %vm931_vm15, 1, %v1972_v22  ;;  %vm930_vm2 = vcmp.ne.f32.partialorder %v898_v49, 0.0  ;;  %v2355_v49 = vrot.slane %v659_v19, 1 }
 0x285   : > { %v2338_v20 = vsel %vm1309_vm4, %v1280_v63, -inf  ;;  %v2344_v32 = vsel %vm930_vm2, 1, %v1972_v22  ;;  %v1219_v41 = vperm.slane %v1187_v44, 0  ;;  %vm933_vm15 = vcmp.ne.f32.partialorder %v901_v21, 0.0 }
 0x286   : > { %v1218_v60 = vperm.slane %v2344_v32, 0  ;;  %vm944_vm2 = vcmp.ne.f32.partialorder %v912_v26, 0.0  ;;  %v795_v63 = vperm.slane %v715_v53, %v2176_v47  ;;  %v1846_v62 = vpack.i.b16 %v2355_v49, %v2355_v49 }
 0x287   : > { %v2387_v44 = vsel %vm933_vm15, 1, %v1972_v22  ;;  %v2390_v11 = vsel %vm944_vm2, 1, %v1972_v22  ;;  %v915_v19 = vunpack.c.l.bf16 %v827_v58  ;;  %v799_v21 = vperm.slane %v1841_v50, %v2176_v47 }
 0x288   : > { %vm2405_vm10 = vcmp.eq.s32.totalorder %v1226_v30, 1  ;;  %v1232_v51 = vperm.slane %v2390_v11, 0  ;;  %v719_v11 = vpack.i.b16 %v687_v2, %v687_v2  ;;  %vm2454_vm2 = vcmp.eq.s32.totalorder %v1218_v60, 1 }
 0x289   : > { %vm947_vm14 = vcmp.ne.f32.partialorder %v915_v19, 0.0  ;;  %v695_v38 = vunpack.i.h.s16 %v2355_v49 }
 0x28b   : > { %v2193_v59 = vpop.permute.xlu2 %996 }
 0x28c   : > { %v1281_v54 = vsel %vm2283_vm13, %v2193_v59, -1e+30  ;;  %v662_v59 = vsel %vm621_vm9, %v2291_v34, %v2307_v57  ;;  %vm2401_vm9 = vcmp.eq.s32.totalorder %v1215_v3, 1  ;;  %vm2409_vm13 = vcmp.ne.f32.partialorder %v904_v61, 0.0 }
 0x28d   : > { %v2376_v52 = vsel %vm1309_vm4, %v1281_v54, -inf  ;;  %v2413_v46 = vrot.slane %v662_v59, 2  ;;  %v1222_v3 = vperm.slane %v2380_v28, 0  ;;  %v839_v54 = vperm.slane %v1846_v62, %v2176_v47 }
 0x28e   : > { %v2437_v24 = vsel %vm2409_vm13, 1, %v1972_v22  ;;  %v689_v28 = vunpack.i.h.s16 %v2260_v9  ;;  %v807_v62 = vperm.slane %v1842_v0, %v2176_v47 }
 0x28f   : > { %v697_v59 = vunpack.i.h.s16 %v2413_v46  ;;  %v918_v9 = vunpack.c.l.bf16 %v839_v54  ;;  %v1224_v39 = vperm.slane %v2437_v24, 0  ;;  %v811_v24 = vperm.slane %v719_v11, %v2176_v47 }
 0x290   : > { %v721_v54 = vpack.i.b16 %v689_v28, %v689_v28  ;;  %vm2492_vm13 = vcmp.eq.s32.totalorder %v1222_v3, 1  ;;  %v665_v11 = vsel %vm625_vm12, %v2291_v34, %v2307_v57  ;;  %vm2513_vm12 = vcmp.eq.s32.totalorder %v1232_v51, 1 }
 0x291   : > { %v729_v2 = vpack.i.b16 %v697_v59, %v697_v59 }
 0x293   : > { %v2226_v29 = vpop.permute.xlu2 %1017  ;;  %v851_v32 = vperm.slane %v729_v2, %v2176_v47  ;;  %v2519_v2 = vrot.slane %v665_v11, 3 }
 0x294   : > { %v1284_v26 = vsel %vm2314_vm0, %v2226_v29, -1e+30  ;;  %vm937_vm0 = vcmp.ne.f32.partialorder %v905_v14, 0.0  ;;  %v908_v14 = vunpack.c.l.bf16 %v799_v21 }
 0x295   : > { %v1322_v58 = vsel %vm1309_vm4, %v1284_v26, -inf  ;;  %v2450_v26 = vsel %vm947_vm14, 1, %v1972_v22 }
 0x29b   : > { %v2204_v6 = vpop.permute.xlu1 %975  ;;  %v2274_v17 = vpop.permute.xlu2 %1038 }
 0x29c   : > { %v2206_v8 = vpop.permute.xlu0 %961  ;;  %v1287_v21 = vsel %vm2363_vm8, %v2274_v17, -1e+30  ;;  %v657_v17 = vsel %vm612_vm11, %v2291_v34, %v2307_v57  ;;  %vm2468_vm8 = vcmp.eq.s32.totalorder %v1229_v4, 1  ;;  %vm2482_vm11 = vcmp.ne.f32.partialorder %v918_v9, 0.0 }
 0x29d   : > { %v1276_v12 = vsel %vm2318_vm1, %v2206_v8, -1e+30  ;;  %v907_v8 = vunpack.c.l.bf16 %v795_v63  ;;  %vm2425_vm1 = vcmp.eq.s32.totalorder %v1219_v41, 1  ;;  %v2432_v63 = vsel %vm937_vm0, 1, %v1972_v22 }
 0x29e   : > { %v1310_v50 = vsel %vm1309_vm4, %v1276_v12, -inf  ;;  %v1278_v41 = vsel %vm2347_vm7, %v2204_v6, -1e+30  ;;  %v1225_v6 = vperm.slane %v2432_v63, 0  ;;  %vm940_vm7 = vcmp.ne.f32.partialorder %v908_v14, 0.0 }
 0x29f   : > { %vm939_vm15 = vcmp.ne.f32.partialorder %v907_v8, 0.0  ;;  %v1315_v19 = vmax.f32 %v1310_v50, %v2338_v20  ;;  %v2466_v20 = vsel %vm1309_vm4, %v1278_v41, -inf  ;;  %v2475_v50 = vsel %vm1309_vm4, %v1287_v21, -inf }
 0x2a0   : > { %v1195_v60 = vsel %vm939_vm15, 1, %v1972_v22  ;;  %v1235_v14 = vperm.slane %v2450_v26, 0  ;;  %v910_v63 = vunpack.c.l.bf16 %v807_v62  ;;  %v1196_v4 = vsel %vm940_vm7, 1, %v1972_v22 }
 0x2a1   : > { %v2479_v30 = vmax.f32 %v1315_v19, %v1322_v58  ;;  %v693_v8 = vunpack.i.h.s16 %v657_v17  ;;  %v1227_v58 = vperm.slane %v1195_v60, 0  ;;  %v1228_v3 = vperm.slane %v1196_v4, 0 }
 0x2a2   : > { %v911_v21 = vunpack.c.l.bf16 %v811_v24  ;;  %v1844_v9 = vpack.i.b16 %v2281_v23, %v2281_v23  ;;  %v1845_v24 = vpack.i.b16 %v657_v17, %v657_v17  ;;  %vm2548_vm0 = vcmp.eq.s32.totalorder %v1225_v6, 1 }
 0x2a3   : > { %v2229_v33 = vpop.permute.xlu1 %982  ;;  %v2341_v31 = vpop.permute.xlu2 %1059  ;;  %v725_v49 = vpack.i.b16 %v693_v8, %v693_v8  ;;  %v921_v8 = vunpack.c.l.bf16 %v851_v32  ;;  %vm2565_vm14 = vcmp.eq.s32.totalorder %v1227_v58, 1  ;;  %vm2579_vm7 = vcmp.eq.s32.totalorder %v1228_v3, 1 }
 0x2a4   : > { %v2234_v40 = vpop.permute.xlu0 %968  ;;  %v1279_v59 = vsel %vm2401_vm9, %v2229_v33, -1e+30  ;;  %v1290_v28 = vsel %vm2405_vm10, %v2341_v31, -1e+30  ;;  %v819_v33 = vperm.slane %v721_v54, %v2176_v47  ;;  %vm942_vm9 = vcmp.ne.f32.partialorder %v910_v63, 0.0 }
 0x2a5   : > { %v1277_v19 = vsel %vm2415_vm6, %v2234_v40, -1e+30  ;;  %v1313_v57 = vsel %vm1309_vm4, %v1279_v59, -inf  ;;  %v2525_v23 = vsel %vm1309_vm4, %v1290_v28, -inf  ;;  %v2849_v63 = vperm.slane %v2387_v44, 0 }
 0x2a6   : > { %v2522_v54 = vsel %vm1309_vm4, %v1277_v19, -inf  ;;  %v1198_v4 = vsel %vm942_vm9, 1, %v1972_v22  ;;  %v913_v59 = vunpack.c.l.bf16 %v819_v33  ;;  %v727_v28 = vpack.i.b16 %v695_v38, %v695_v38 }
 0x2a7   : > { %vm2529_vm10 = vcmp.eq.s32.totalorder %v2849_v63, 1  ;;  %vm943_vm6 = vcmp.ne.f32.partialorder %v911_v21, 0.0  ;;  %v823_v44 = vperm.slane %v1844_v9, %v2176_v47  ;;  %v1847_v19 = vpack.i.b16 %v2413_v46, %v2413_v46 }
 0x2a8   : > { %v835_v32 = vperm.slane %v725_v49, %v2176_v47  ;;  %v699_v33 = vunpack.i.h.s16 %v2519_v2  ;;  %v1317_v38 = vmax.f32 %v2522_v54, %v2376_v52  ;;  %v831_v6 = vperm.slane %v1845_v24, %v2176_v47 }
 0x2a9   : > { %vm945_vm15 = vcmp.ne.f32.partialorder %v913_v59, 0.0  ;;  %v843_v52 = vperm.slane %v727_v28, %v2176_v47  ;;  %v1848_v62 = vpack.i.b16 %v2519_v2, %v2519_v2 }
 0x2aa   : > { %v917_v24 = vunpack.c.l.bf16 %v835_v32 }
 0x2ab   : > { %v2271_v15 = vpop.permute.xlu1 %1010  ;;  %v2429_v61 = vpop.permute.xlu2 %1080  ;;  %v919_v32 = vunpack.c.l.bf16 %v843_v52 }
 0x2ac   : > { %v2276_v18 = vpop.permute.xlu0 %1003  ;;  %v1283_v40 = vsel %vm2425_vm1, %v2271_v15, -1e+30  ;;  %v2536_v15 = vsel %vm2482_vm11, 1, %v1972_v22  ;;  %v1293_v46 = vsel %vm2468_vm8, %v2429_v61, -1e+30  ;;  %vm2560_vm1 = vcmp.eq.s32.totalorder %v1224_v39, 1 }
 0x2ad   : > { %v1320_v11 = vsel %vm1309_vm4, %v1283_v40, -inf  ;;  %v1282_v41 = vsel %vm2454_vm2, %v2276_v18, -1e+30  ;;  %v1238_v17 = vperm.slane %v2536_v15, 0  ;;  %v1230_v18 = vperm.slane %v1198_v4, 0 }
 0x2ae   : > { %v1321_v21 = vmax.f32 %v1313_v57, %v1320_v11  ;;  %v1199_v40 = vsel %vm943_vm6, 1, %v1972_v22  ;;  %v1318_v37 = vsel %vm1309_vm4, %v1282_v41, -inf  ;;  %vm953_vm2 = vcmp.ne.f32.partialorder %v921_v8, 0.0 }
 0x2af   : > { %v914_v61 = vunpack.c.l.bf16 %v823_v44  ;;  %v847_v39 = vperm.slane %v1847_v19, %v2176_v47  ;;  %v2574_v49 = vsel %vm1309_vm4, %v1293_v46, -inf  ;;  %v731_v4 = vpack.i.b16 %v699_v33, %v699_v33 }
 0x2b0   : > { %v1231_v28 = vperm.slane %v1199_v40, 0  ;;  %v1201_v11 = vsel %vm945_vm15, 1, %v1972_v22  ;;  %v916_v19 = vunpack.c.l.bf16 %v831_v6  ;;  %v2594_v3 = vmax.f32 %v1321_v21, %v2475_v50 }
 0x2b1   : > { %v1209_v41 = vsel %vm953_vm2, 1, %v1972_v22  ;;  %vm2602_vm8 = vcmp.eq.s32.totalorder %v1230_v18, 1  ;;  %vm946_vm11 = vcmp.ne.f32.partialorder %v914_v61, 0.0  ;;  %v920_v2 = vunpack.c.l.bf16 %v847_v39 }
 0x2b2   : > { %v1233_v50 = vperm.slane %v1201_v11, 0  ;;  %v859_v8 = vperm.slane %v731_v4, %v2176_v47  ;;  %vm2610_vm9 = vcmp.eq.s32.totalorder %v1231_v28, 1  ;;  %v1241_v29 = vperm.slane %v1209_v41, 0 }
 0x2b3   : > { %v2330_v10 = vpop.permute.xlu1 %1031  ;;  %v2505_v31 = vpop.permute.xlu2 %1101  ;;  %v1202_v45 = vsel %vm946_vm11, 1, %v1972_v22  ;;  %vm951_vm6 = vcmp.ne.f32.partialorder %v919_v32, 0.0  ;;  %vm952_vm15 = vcmp.ne.f32.partialorder %v920_v2, 0.0 }
 0x2b4   : > { %v2332_v55 = vpop.permute.xlu0 %1024  ;;  %v1286_v58 = vsel %vm2492_vm13, %v2330_v10, -1e+30  ;;  %v1319_v10 = vmax.f32 %v2466_v20, %v1318_v37  ;;  %v1296_v46 = vsel %vm2513_vm12, %v2505_v31, -1e+30  ;;  %vm949_vm13 = vcmp.ne.f32.partialorder %v917_v24, 0.0 }
 0x2b5   : > { %v1326_v33 = vsel %vm1309_vm4, %v1286_v58, -inf  ;;  %v1285_v20 = vsel %vm2529_vm10, %v2332_v55, -1e+30  ;;  %vm948_vm12 = vcmp.ne.f32.partialorder %v916_v19, 0.0  ;;  %v855_v31 = vperm.slane %v1848_v62, %v2176_v47 }
 0x2b6   : > { %v2615_v18 = vmax.f32 %v1319_v10, %v1326_v33  ;;  %v2618_v40 = vsel %vm1309_vm4, %v1296_v46, -inf  ;;  %vm2622_vm10 = vcmp.eq.s32.totalorder %v1235_v14, 1  ;;  %v1324_v52 = vsel %vm1309_vm4, %v1285_v20, -inf }
 0x2b7   : > { %v1205_v37 = vsel %vm949_vm13, 1, %v1972_v22  ;;  %vm2635_vm2 = vcmp.eq.s32.totalorder %v1233_v50, 1  ;;  %v1204_v39 = vsel %vm948_vm12, 1, %v1972_v22  ;;  %v923_v58 = vunpack.c.l.bf16 %v859_v8 }
 0x2b8   : > { %v1207_v4 = vsel %vm951_vm6, 1, %v1972_v22  ;;  %v922_v28 = vunpack.c.l.bf16 %v855_v31  ;;  %v1325_v11 = vmax.f32 %v1317_v38, %v1324_v52  ;;  %v1237_v19 = vperm.slane %v1205_v37, 0 }
 0x2b9   : > { %v1208_v62 = vsel %vm952_vm15, 1, %v1972_v22  ;;  %v1335_v38 = vmax.f32 %v2615_v18, %v2525_v23  ;;  %v1236_v41 = vperm.slane %v1204_v39, 0  ;;  %v1239_v32 = vperm.slane %v1207_v4, 0 }
 0x2ba   : > { %v1240_v57 = vperm.slane %v1208_v62, 0  ;;  %vm2675_vm13 = vcmp.eq.s32.totalorder %v1237_v19, 1  ;;  %vm1478_vm15 = vcmask 1043456  }
 0x2bb   : > { %v2382_v7 = vpop.permute.xlu1 %1052  ;;  %v2585_v59 = vpop.permute.xlu2 %1122 }
 0x2bc   : > { %v2392_v16 = vpop.permute.xlu0 %1045  ;;  %v1289_v47 = vsel %vm2548_vm0, %v2382_v7, -1e+30  ;;  %v1234_v7 = vperm.slane %v1202_v45, 0  ;;  %vm2647_vm0 = vcmp.eq.s32.totalorder %v1238_v17, 1  ;;  %v1299_v18 = vsel %vm2622_vm10, %v2585_v59, -1e+30 }
 0x2bd   : > { %v1288_v26 = vsel %vm2560_vm1, %v2392_v16, -1e+30  ;;  %v1332_v16 = vsel %vm1309_vm4, %v1289_v47, -inf  ;;  %vm955_vm1 = vcmp.ne.f32.partialorder %v923_v58, 0.0  ;;  %vm2701_vm12 = vcmp.eq.s32.totalorder %v1240_v57, 1 }
 0x2be   : > { %v1330_v9 = vsel %vm1309_vm4, %v1288_v26, -inf  ;;  %v1333_v33 = vmax.f32 %v1325_v11, %v1332_v16  ;;  %vm2666_vm11 = vcmp.eq.s32.totalorder %v1234_v7, 1  ;;  %v1352_v58 = vsel %vm1309_vm4, %v1299_v18, -inf }
 0x2bf   : > { %v1331_v23 = vmax.f32 %v2479_v30, %v1330_v9  ;;  %v1211_v30 = vsel %vm955_vm1, 1, %v1972_v22  ;;  %v1375_v18 = vunpack.c.l.bf16 %v2169_v43  ;;  %v1545_v43 = vld [vmem:[%s2805_s5] sm:$0xf] }
 0x2c0   : > { %v1341_v7 = vmax.f32 %v1333_v33, %v2574_v49 }
 0x2c3   : > { %v2452_v12 = vpop.permute.xlu1 %1073  ;;  %v1144_v10 = vpop.permute.xlu2 %1143 }
 0x2c4   : > { %v2460_v0 = vpop.permute.xlu0 %1066 }
 0x2c5   : > { %v1291_v63 = vsel %vm2565_vm14, %v2460_v0, -1e+30  ;;  %v1292_v0 = vsel %vm2579_vm7, %v2452_v12, -1e+30  ;;  %vm2662_vm14 = vcmp.eq.s32.totalorder %v1241_v29, 1  ;;  %vm954_vm7 = vcmp.ne.f32.partialorder %v922_v28, 0.0 }
 0x2c6   : > { %v1336_v15 = vsel %vm1309_vm4, %v1291_v63, -inf  ;;  %v1338_v2 = vsel %vm1309_vm4, %v1292_v0, -inf }
 0x2c7   : > { %v1337_v50 = vmax.f32 %v2594_v3, %v1336_v15  ;;  %v1210_v3 = vsel %vm954_vm7, 1, %v1972_v22  ;;  %v1339_v45 = vmax.f32 %v1331_v23, %v1338_v2  ;;  %v1243_v22 = vperm.slane %v1211_v30, 0 }
 0x2c8   : > { %v1242_v39 = vperm.slane %v1210_v3, 0  ;;  %v1374_v3 = vunpack.c.l.bf16 %v2163_v35  ;;  %v1377_v35 = vunpack.c.l.bf16 %v2291_v34 }
 0x2c9   : > { %v1347_v11 = vmax.f32 %v1339_v45, %v2618_v40  ;;  %vm1275_vm10 = vcmp.eq.s32.totalorder %v1243_v22, 1 }
 0x2ca   : > { %vm2724_vm6 = vcmp.eq.s32.totalorder %v1242_v39, 1 }
 0x2cb   : > { %v2517_v60 = vpop.permute.xlu1 %1094  ;;  %v1165_v4 = vpop.permute.xlu2 %1164 }
 0x2cc   : > { %v2538_v51 = vpop.permute.xlu0 %1087  ;;  %v1295_v17 = vsel %vm2610_vm9, %v2517_v60, -1e+30  ;;  %vm2681_vm9 = vcmp.eq.s32.totalorder %v1236_v41, 1  ;;  %v1305_v53 = vsel %vm2662_vm14, %v1165_v4, -1e+30 }
 0x2cd   : > { %v1294_v60 = vsel %vm2602_vm8, %v2538_v51, -1e+30  ;;  %v1344_v8 = vsel %vm1309_vm4, %v1295_v17, -inf  ;;  %vm2692_vm8 = vcmp.eq.s32.totalorder %v1239_v32, 1 }
 0x2ce   : > { %v1342_v52 = vsel %vm1309_vm4, %v1294_v60, -inf  ;;  %v1364_v60 = vsel %vm1309_vm4, %v1305_v53, -inf }
 0x2cf   : > { %v1343_v63 = vmax.f32 %v1335_v38, %v1342_v52 }
 0x2d3   : > { %v2583_v54 = vpop.permute.xlu1 %1115 }
 0x2d4   : > { %v2588_v44 = vpop.permute.xlu0 %1108  ;;  %v1298_v51 = vsel %vm2666_vm11, %v2583_v54, -1e+30  ;;  %v1345_v54 = vmax.f32 %v1337_v50, %v1344_v8 }
 0x2d5   : > { %v1297_v29 = vsel %vm2635_vm2, %v2588_v44, -1e+30  ;;  %v1350_v59 = vsel %vm1309_vm4, %v1298_v51, -inf  ;;  %v1376_v44 = vunpack.c.l.bf16 %v2202_v5  ;;  %vm1471_vm2 = vcmask 31744  }
 0x2d6   : > { %v1348_v14 = vsel %vm1309_vm4, %v1297_v29, -inf  ;;  %v1351_v62 = vmax.f32 %v1343_v63, %v1350_v59  ;;  %v1353_v0 = vmax.f32 %v1345_v54, %v1352_v58  ;;  %v1308_v29 = vld [vmem:[#allocation4] sm:$0xf] }
 0x2d7   : > { %v1349_v19 = vmax.f32 %v1341_v7, %v1348_v14 }
 0x2db   : > { %v1137_v61 = vpop.permute.xlu1 %1136 }
 0x2dc   : > { %v1130_v24 = vpop.permute.xlu0 %1129  ;;  %v1301_v37 = vsel %vm2675_vm13, %v1137_v61, -1e+30 }
 0x2dd   : > { %v1300_v26 = vsel %vm2681_vm9, %v1130_v24, -1e+30  ;;  %v1302_v24 = vsel %vm2647_vm0, %v1144_v10, -1e+30  ;;  %v1356_v28 = vsel %vm1309_vm4, %v1301_v37, -inf }
 0x2de   : > { %v1354_v16 = vsel %vm1309_vm4, %v1300_v26, -inf  ;;  %v1357_v10 = vmax.f32 %v1349_v19, %v1356_v28  ;;  %v1358_v15 = vsel %vm1309_vm4, %v1302_v24, -inf  ;;  %v1438_v19 = vld [vmem:[%s2805_s5] sm:$0xf] }
 0x2df   : > { %v1355_v41 = vmax.f32 %v1347_v11, %v1354_v16  ;;  %v1359_v23 = vmax.f32 %v1351_v62, %v1358_v15 }
 0x2e0   : > { %v1365_v50 = vmax.f32 %v1357_v10, %v1364_v60 }
 0x2e3   : > { %v1158_v6 = vpop.permute.xlu1 %1157 }
 0x2e4   : > { %v1151_v47 = vpop.permute.xlu0 %1150  ;;  %v1304_v61 = vsel %vm2701_vm12, %v1158_v6, -1e+30  ;;  %v1434_v6 = vld [vmem:[#allocation4] sm:$0xf] }
 0x2e5   : > { %v1303_v55 = vsel %vm2692_vm8, %v1151_v47, -1e+30  ;;  %v1362_v49 = vsel %vm1309_vm4, %v1304_v61, -inf }
 0x2e6   : > { %v1360_v9 = vsel %vm1309_vm4, %v1303_v55, -inf  ;;  %v1363_v12 = vmax.f32 %v1355_v41, %v1362_v49 }
 0x2e7   : > { %v1361_v17 = vmax.f32 %v1353_v0, %v1360_v9 }
 0x2e8   : > { %v1370_v21 = vmax.f32 %v1363_v12, %v1365_v50 }
 0x2eb   : > { %v1179_v40 = vpop.permute.xlu1 %1178 }
 0x2ec   : > { %v1307_v32 = vsel %vm1275_vm10, %v1179_v40, -1e+30  ;;  %v1172_v33 = vpop.permute.xlu0 %1171 }
 0x2ed   : > { %v1368_v57 = vsel %vm1309_vm4, %v1307_v32, -inf  ;;  %v1306_v2 = vsel %vm2724_vm6, %v1172_v33, -1e+30  ;;  %v1596_v33 = vld [vmem:[#allocation6] sm:$0xff] }
 0x2ee   : > { %v1369_v20 = vmax.f32 %v1361_v17, %v1368_v57  ;;  %v1366_v46 = vsel %vm1309_vm4, %v1306_v2, -inf }
 0x2ef   : > { %v1367_v8 = vmax.f32 %v1359_v23, %v1366_v46 }
 0x2f1   : > { %v1371_v30 = vmax.f32 %v1367_v8, %v1369_v20 }
 0x2f3   : > { %v1372_v51 = vmax.f32 %v1370_v21, %v1371_v30 }
 0x2f5   : > { %v1373_v31 = vmax.f32 %v1308_v29, %v1372_v51 }
 0x2f7   : > { %1849 = vmatpush.xpose.msk.msrb.mxu0 %vm474_vm3, %v1373_v31  ;;  %v1435_v45 = vsub.f32 %v1434_v6, %v1373_v31  ;;  %1637 = vst.msk [vmem:[#allocation4] sm:$0xf] %vm1309_vm4, %v1373_v31  ;;  %1878 = vmatpush.xpose.msk.msra.mxu3 %vm474_vm3, %v1373_v31 }
 0x2f9   : > { %v1436_v52 = vmul.f32 1.442695, %v1435_v45 }
 0x2fa   : > { %1850 = vmatmul.msk.f32.vlgmr.msrb.gmra.mxu0 %vm474_vm3, %v1374_v3  ;;  %1851 = vmatmul.msk.f32.vlgmr.msra.gmra.mxu3 %vm474_vm3, %v1375_v18 }
 0x2fb   : > { %1913 = vpow2.f32 %v1436_v52  ;;  %1858 = vmatpush.msk.msrb.mxu3 %vm1478_vm15, %v1545_v43  ;;  %1854 = vmatpush.msk.msra.mxu0 %vm1478_vm15, %v1438_v19 }
 0x301   : > { %v2744_v47 = vpop.eup %1913 }
 0x302   : > { %1439 = vxpose.xlu0.b32.start.end [1/1] (short) (narrow) %v2744_v47, 16  ;;  %1852 = vmatmul.msk.f32.gmra.mxu3 %vm474_vm3, %v1376_v44 }
 0x30a   : > { %1853 = vmatmul.msk.f32.gmra.mxu3 %vm474_vm3, %v1377_v35 }
 0x377   : > { %v1410_v54 = vpop.f32.mrf.mxu0 }
 0x378   : > { %v1422_v5 = vsub.f32 %v2119_v56, %v1410_v54  ;;  %v1923_v56 = vld [vmem:[%s2050_s23] sm:$0xff] }
 0x37a   : > { %v1426_v37 = vmul.f32 1.442695, %v1422_v5 }
 0x37c   : > { %1915 = vpow2.f32 %v1426_v37 }
 0x37d   : > { %v1413_v26 = vpop.f32.mrf.mxu3 }
 0x37e   : > { %v1423_v22 = vsub.f32 %v2128_v1, %v1413_v26 }
 0x380   : > { %v1428_v14 = vmul.f32 1.442695, %v1423_v22 }
 0x382   : > { %v1916_v34 = vpop.eup %1915  ;;  %1917 = vpow2.f32 %v1428_v14 }
 0x383   : > { %1859 = vmatmul.msk.f32.vlgmr.msrb.gmra.mxu3 %vm1471_vm2, %v1916_v34 }
 0x385   : > { %v1416_v59 = vpop.f32.mrf.mxu3 }
 0x386   : > { %v1424_v55 = vsub.f32 %v2140_v13, %v1416_v59  ;;  %v1924_v13 = vld [vmem:[%s2050_s23 + $0x8] sm:$0xff] }
 0x388   : > { %v1918_v39 = vpop.eup %1917  ;;  %v1430_v58 = vmul.f32 1.442695, %v1424_v55 }
 0x389   : > { %v1507_v63 = vpack.c.bf16 %v1918_v39, %v1916_v34 }
 0x38a   : > { %1919 = vpow2.f32 %v1430_v58 }
 0x38b   : > { %1860 = vmatmul.msk.f32.gmra.mxu3 %vm1471_vm2, %v1918_v39 }
 0x38c   : > { %1908 = vxpose.binary.xlu2.c.b16.start [1/4] (short) (narrow) %v1507_v63, %v1923_v56, 16 }
 0x38d   : > { %v1419_v7 = vpop.f32.mrf.mxu3 }
 0x38e   : > { %v1425_v1 = vsub.f32 %v2152_v25, %v1419_v7 }
 0x390   : > { %v1432_v61 = vmul.f32 1.442695, %v1425_v1  ;;  %v1920_v24 = vpop.eup %1919 }
 0x392   : > { %1921 = vpow2.f32 %v1432_v61 }
 0x393   : > { %1861 = vmatmul.msk.f32.gmra.mxu3 %vm1471_vm2, %v1920_v24 }
 0x398   : > { %v1922_v4 = vpop.eup %1921 }
 0x399   : > { %v1508_v28 = vpack.c.bf16 %v1922_v4, %v1920_v24 }
 0x39b   : > { %1862 = vmatmul.msk.f32.gmra.mxu3 %vm1471_vm2, %v1922_v4 }
 0x39c   : > { %1909 = vxpose.binary.xlu2.c.b16.end [2/4] (short) (narrow) %v1508_v28, %v1924_v13, 16 }
 0x3a6   : > { %v1455_v62 = vpop.trf.xlu0 }
 0x3a7   : > { %1855 = vmatmul.msk.f32.vlgmr.msra.gmra.mxu0 %vm1471_vm2, %v1455_v62 }
 0x3ae   : > { %v1456_v9 = vpop.trf.xlu0 }
 0x3af   : > { %1856 = vmatmul.msk.f32.gmra.mxu0 %vm1471_vm2, %v1456_v9 }
 0x406   : > { %v1578_v11 = vpop.f32.mrf.mxu3 }
 0x407   : > { %v1590_v41 = vmul.f32 %v1578_v11, %v2099_v27  ;;  %v1597_v27 = vld [vmem:[#allocation6 + $0x8] sm:$0xff] }
 0x40e   : > { %v1581_v16 = vpop.f32.mrf.mxu3 }
 0x40f   : > { %v1591_v53 = vmul.f32 %v1581_v16, %v2105_v36 }
 0x411   : > { %v1594_v40 = vpack.c.bf16 %v1591_v53, %v1590_v41 }
 0x416   : > { %v1584_v25 = vpop.f32.mrf.mxu3 }
 0x417   : > { %v1592_v0 = vmul.f32 %v1584_v25, %v2109_v42  ;;  %v1505_v42 = vld [vmem:[#allocation5] sm:$0xf] }
 0x41e   : > { %v1587_v49 = vpop.f32.mrf.mxu3 }
 0x41f   : > { %v1593_v38 = vmul.f32 %v1587_v49, %v2113_v48  ;;  %v1506_v48 = vmul.f32 %v2744_v47, %v1505_v42 }
 0x421   : > { %v1595_v10 = vpack.c.bf16 %v1593_v38, %v1592_v0 }
 0x423   : > { %1625 = vmatpush.bf16.msrb.mxu2 %v1595_v10 }
 0x424   : > { %v1499_v32 = vpop.f32.mrf.mxu0 }
 0x425   : > { %v1598_v12 = vmul.f32 %v1596_v33, %v1499_v32 }
 0x427   : > { %1626 = vmatpush.bf16.msrb.mxu2 %v1594_v40 }
 0x42c   : > { %v1502_v2 = vpop.f32.mrf.mxu0 }
 0x42d   : > { %v1910_v15 = vpop.trf.xlu2  ;;  %v1599_v20 = vmul.f32 %v1597_v27, %v1502_v2 }
 0x42e   : > { %1863 = vmatmul.msk.bf16.vlgmr.msrb.gmra.mxu2 %vm566_vm5, %v1910_v15 }
 0x435   : > { %v1911_v17 = vpop.trf.xlu2 }
 0x436   : > { %1857 = vmatmul.msk.bf16.vlgmr.msrb.gmra.mxu1 %vm566_vm5, %v1911_v17 }
 0x4b1   : > { %v1628_v57 = vpop.f32.mrf.mxu2 }
 0x4b2   : > { %v1633_v36 = vadd.f32 %v1628_v57, %v1598_v12 }
 0x4b3   : > { %v1539_v23 = vpop.f32.mrf.mxu1 }
 0x4b4   : > { %v1543_v60 = vadd.f32 %v1539_v23, %v1506_v48  ;;  %1635 = vst.msk [vmem:[#allocation6] sm:$0xff] %vm566_vm5, %v1633_v36 }
 0x4b6   : > { %1544 = vst.msk [vmem:[#allocation5] sm:$0xf] %vm1309_vm4, %v1543_v60 }
 0x4b8   : > { %1641 = sbr.rel (%p1864_p5) target bundleno = 1527 (0x5f7), region = 68 }
 0x4b9   : > { %v1630_v46 = vpop.f32.mrf.mxu2 }
 0x4ba   : > { %v1634_v50 = vadd.f32 %v1630_v46, %v1599_v20 }
 0x4bb   : > { %v1541_v8 = vpop.f32.mrf.mxu1 }
 0x4bc   : > { %1636 = vst.msk [vmem:[#allocation6 + $0x8] sm:$0xff] %vm566_vm5, %v1634_v50 }
 0x4bd   : > { %v1642_v21 = vld [vmem:[#allocation5] sm:$0xf]  ;;  %v1645_v30 = vld [vmem:[%s2805_s5] sm:$0xf]  ;;  %v1710_v3 = vld [vmem:[#allocation6] sm:$0xff] }
 0x4be   : > { %v1643_v29 = vadd.f32 1e-16, %v1642_v21  ;;  %1865 = vmatpush.msk.msra.mxu0 %vm1478_vm15, %v1645_v30  ;;  %1879 = vmatpush.msk.msra.mxu1 %vm1478_vm15, %v1645_v30  ;;  %v1925_v18 = vld [vmem:[%s2806_s6] ss:$0 sm:$0xff] }
 0x4c0   : > { %1926 = vrcp.f32 %v1643_v29 }
 0x4c3   : > { %v1711_v47 = vld [vmem:[#allocation6 + $0x8] sm:$0xff] }
 0x4c6   : > { %v1927_v51 = vpop.eup %1926 }
 0x4c7   : > { %1646 = vxpose.xlu0.b32.start.end [1/1] (short) (narrow) %v1927_v51, 16 }
 0x56b   : > { %v1662_v6 = vpop.trf.xlu0 }
 0x56c   : > { %1866 = vmatmul.msk.f32.vlgmr.msra.gmra.mxu0 %vm1471_vm2, %v1662_v6 }
 0x573   : > { %v1663_v31 = vpop.trf.xlu0 }
 0x574   : > { %1867 = vmatmul.msk.f32.vlgmr.msra.gmra.mxu1 %vm1471_vm2, %v1663_v31 }
 0x5e9   : > { %v1704_v45 = vpop.f32.mrf.mxu0 }
 0x5ea   : > { %v1712_v52 = vmul.f32 %v1710_v3, %v1704_v45 }
 0x5ec   : > { %v1718_v44 = vadd.f32 %v1925_v18, %v1712_v52 }
 0x5ee   : > { %1720 = vst.msk [vmem:[#allocation7] sm:$0xff] %vm566_vm5, %v1718_v44 }
 0x5f1   : > { %v1707_v35 = vpop.f32.mrf.mxu1 }
 0x5f2   : > { %v1713_v43 = vmul.f32 %v1711_v47, %v1707_v35 }
 0x5f4   : > { %v1719_v54 = vadd.f32 %v1925_v18, %v1713_v43 }
 0x5f6   : > { %1721 = vst.msk [vmem:[#allocation7 + $0x8] sm:$0xff] %vm566_vm5, %v1719_v54 }
 0x5f7 PF: > { %p1884_p6 = scmp.eq.s32.totalorder %s2037_s14, 1  ;;  %s1973_s21 = smov [#allocation7]  }
 0x5f8   : > { %s1727_s22 = sshll.u32 %s1973_s21, 4  ;;  %s1729_s27 = sshll.u32 %s2810_s10, 4  ;;  %s1728_s22 = int_to_ptr.vmem [resolvable:$true] %s1727_s22  ;;  %s1730_s27 = int_to_ptr.hbm [resolvable:$true] %s1729_s27 }
 0x5f9   : > { %s1974_s28 = smov 128   ;;  %s1975_s29 = smov 8  }
 0x5fa   : > { %1881 = dma.vmem_to_hbm [thread:$0]  (%p1884_p6), %s1728_s22, 256, %s1730_s27, [#allocation8], %s1974_s28, %s1974_s28, %s1975_s29  }
 0x5fb   : > { %1961 = dma.done.wait (%p1884_p6), [#allocation8], 256  }
 0x5fc   : > { %1963 = vsyncadd (%p1884_p6), [#allocation8], 4294967040 }
 0x5fd PF: > { %s21_s13 = sadd.s32 1, %s1966_s13  }
 0x5fe   : > { %p18_p7 = scmp.ge.s32.totalorder %s21_s13, 4  }
 0x600   :  { %20 = sbr.rel (!%p18_p7) target bundleno = 1 (0x1), region = 101 }
 0x605   :  { %1746 = vsyncpa [#allocation8], 1 }
 0x606   :  { %1748 = vsyncpa [#allocation8 + $0x1], 1 }

</bundles_post_ra>
